<compile_context>
chip_gen: v7x
topology: tpu7x:2x2x1
jax: 0.10.0
libtpu: 0.0.40
codegen_flags: <defaults>
</compile_context>

<pallas_src>
import math

import jax
import jax.numpy as jnp
from jax.experimental import pallas as pl
from jax.experimental.pallas import tpu as pltpu


def _mirror_agg_kernel(sat_ref, mir_ref, mask_ref, bdm1_ref, bdm2_ref, seg_ref,
                       sat_out_ref, mir_out_ref):
    tb, nd = sat_ref.shape
    n = mask_ref.shape[1]
    d = nd // n

    satr = sat_ref[...].astype(jnp.float32)          # [tb, N*D]  (lane-dense)
    mirr = mir_ref[...].astype(jnp.float32)          # [tb, N*D]

    # ---- satellite update (fully packed / lane-dense) -----------------------
    # sat @ (Wq1^T Wk1 / sqrt(D)) applied to every node chunk at once via the
    # block-diagonal weight: one MXU matmul, K = N*D.
    sat_m1 = jnp.dot(satr, bdm1_ref[...], preferred_element_type=jnp.float32)
    # alpha[b, i] = sum_d sat_m1[b, i*D+d] * mir[b, i*D+d]; the 0/1 block
    # matrix does the segmented D-chunk sum AND broadcasts it back over the
    # chunk's lanes (one MXU matmul, no sub-128 reshapes).
    alpha = jnp.dot(sat_m1 * mirr, seg_ref[...],
                    preferred_element_type=jnp.float32)        # [tb, N*D]
    sat_new = satr + alpha * (mirr - satr)                     # [tb, N*D]
    sat_out_ref[...] = sat_new.astype(sat_out_ref.dtype)       # unmasked stores

    # ---- mirror update ------------------------------------------------------
    # q = mir @ (Wq2^T Wk2 / sqrt(D)) in packed layout, then one reshape to the
    # per-node view for the tiny (N=8) attention block.
    mir_m2 = jnp.dot(mirr, bdm2_ref[...], preferred_element_type=jnp.float32)
    q3 = mir_m2.reshape(tb, n, d)                              # [tb, N, D]

    # beta[b, i, j] = q3[b, i, :] . sat_new[b, j, :]  (scale folded into bdm2).
    # N is small: VPU broadcast-multiply + small-axis reductions, no per-batch
    # MXU matmuls.
    cols = []
    for j in range(n):
        k_j = sat_new[:, j * d:(j + 1) * d][:, None, :]        # [tb, 1, D]
        cols.append(jnp.sum(q3 * k_j, axis=-1, keepdims=True))  # [tb, N, 1]
    beta = jnp.concatenate(cols, axis=-1)                      # [tb, N(i), N(j)]

    # Mask invalid satellite columns; a large finite negative keeps
    # fully-masked (or padded) rows NaN-free.
    valid = (mask_ref[...] != 0)[:, None, :]                   # [tb, 1, N]
    beta = jnp.where(valid, beta, -1e30)

    # Numerically stable softmax over j; denominator reciprocal on the EUP.
    m = jnp.max(beta, axis=-1, keepdims=True)
    e = jnp.exp(beta - m)                                      # [tb, N, N]
    zinv = pl.reciprocal(jnp.sum(e, axis=-1, keepdims=True), approx=True)

    # mirror_new[b, i, :] = sum_j p[b, i, j] * mirror[b, j, :]  (ORIGINAL mir),
    # accumulated with VPU FMAs and normalized once at the end.
    acc = jnp.zeros((tb, n, d), jnp.float32)
    for j in range(n):
        mir_j = mirr[:, j * d:(j + 1) * d][:, None, :]         # [tb, 1, D]
        acc = acc + e[:, :, j][:, :, None] * mir_j             # [tb, N, D]
    mir_new = (acc * zinv).reshape(tb, nd)                     # back to packed
    mir_out_ref[...] = mir_new.astype(mir_out_ref.dtype)       # unmasked stores


def mirror_aggregator(mirror_nodes, satellite_nodes, satellite_node_mask,
                      wq1, wk1, wq2, wk2, *, tb_max=512):
    """Pallas implementation of MirrorAggregator.forward.

    mirror_nodes, satellite_nodes: [B, N, D] float32
    satellite_node_mask:           [B, N] bool
    wq*/wk*: PyTorch nn.Linear weights of shape [D_out, D_in]
    Returns (satellite_nodes_new, mirror_nodes_new), each [B, N, D].
    """
    B, N, D = satellite_nodes.shape
    ND = N * D
    scale = 1.0 / math.sqrt(float(D))

    # Fuse weight pairs once in XLA and fold the 1/sqrt(D) scale in:
    #   x Wq^T . y Wk^T / sqrt(D) == (x @ (Wq^T Wk / sqrt(D))) . y
    m1 = (wq1.T @ wk1).astype(jnp.float32) * scale
    m2 = (wq2.T @ wk2).astype(jnp.float32) * scale

    # Block-diagonal packing (I_N ⊗ M): applies M to every node's D-chunk so
    # the projection is a single lane-dense matmul per tile.
    eye_n = jnp.eye(N, dtype=jnp.float32)
    bdm1 = jnp.kron(eye_n, m1)                                     # [ND, ND]
    bdm2 = jnp.kron(eye_n, m2)                                     # [ND, ND]
    # 0/1 block matrix: segmented sum over each D-chunk, broadcast back.
    seg = jnp.kron(eye_n, jnp.ones((D, D), jnp.float32))           # [ND, ND]
    # TODO(synk): for very large N*D these O((N*D)^2) helper matrices should be
    # replaced with D-chunked matmuls; at N=8, D=32 they are 256 KiB each.

    # Free, contiguity-preserving reshape: (node, feature) packed into lanes.
    sat2 = satellite_nodes.reshape(B, ND)
    mir2 = mirror_nodes.reshape(B, ND)
    mask_i = satellite_node_mask.astype(jnp.int32)

    # Batch tile: full batch if small, otherwise a multiple of 8 (large tiles →
    # large DMAs, amortized per-step pipeline overhead).
    if B <= tb_max:
        tb = B
    else:
        tb = max(8, (tb_max // 8) * 8)
    grid_b = pl.cdiv(B, tb)

    nd_spec = pl.BlockSpec((tb, ND), lambda b: (b, 0))
    mask_spec = pl.BlockSpec((tb, N), lambda b: (b, 0))
    w_spec = pl.BlockSpec((ND, ND), lambda b: (0, 0))

    sat_new, mir_new = pl.pallas_call(
        _mirror_agg_kernel,
        out_shape=(
            jax.ShapeDtypeStruct((B, ND), satellite_nodes.dtype),
            jax.ShapeDtypeStruct((B, ND), mirror_nodes.dtype),
        ),
        grid=(grid_b,),
        in_specs=[nd_spec, nd_spec, mask_spec, w_spec, w_spec, w_spec],
        out_specs=(nd_spec, nd_spec),
        compiler_params=pltpu.CompilerParams(
            dimension_semantics=("parallel",),
            # Explicit limit: fits the ~13 MiB working set at tb=512 with
            # headroom, and stays under v7x's 64 MiB physical VMEM while
            # lifting v5e's 16 MiB scoped default.
            vmem_limit_bytes=48 * 1024 * 1024),
    )(sat2, mir2, mask_i, bdm1, bdm2, seg)

    return sat_new.reshape(B, N, D), mir_new.reshape(B, N, D)


def _reference(mirror_nodes, satellite_nodes, mask, wq1, wk1, wq2, wk2):
    """Pure-JAX reference mirroring the PyTorch forward."""
    D = satellite_nodes.shape[-1]
    scale = 1.0 / math.sqrt(D)
    q1 = satellite_nodes @ wq1.T
    k1 = mirror_nodes @ wk1.T
    alpha = jnp.sum(q1 * k1, axis=-1, keepdims=True) * scale
    sat = satellite_nodes + alpha * (mirror_nodes - satellite_nodes)
    q2 = mirror_nodes @ wq2.T
    k2 = sat @ wk2.T
    beta = jnp.einsum("bnd,bmd->bnm", q2, k2) * scale
    beta = jnp.where(mask[:, None, :], beta, -jnp.inf)
    beta = jax.nn.softmax(beta, axis=-1)
    mir = beta @ mirror_nodes
    return sat, mir


if __name__ == "__main__":
    B, N, D = 2, 8, 32
    key = jax.random.PRNGKey(0)
    k_mir, k_sat, k_mask, k1, k2, k3, k4 = jax.random.split(key, 7)

    mirror_nodes = jax.random.normal(k_mir, (B, N, D), dtype=jnp.float32)
    satellite_nodes = jax.random.normal(k_sat, (B, N, D), dtype=jnp.float32)
    # ensure at least one valid satellite per batch (matches PyTorch behavior)
    satellite_node_mask = (jax.random.uniform(k_mask, (B, N)) > 0.3).at[:, 0].set(True)

    # deterministic Linear weights, PyTorch shape [out, in]
    bound = 1.0 / math.sqrt(D)
    wq1 = jax.random.uniform(k1, (D, D), minval=-bound, maxval=bound, dtype=jnp.float32)
    wk1 = jax.random.uniform(k2, (D, D), minval=-bound, maxval=bound, dtype=jnp.float32)
    wq2 = jax.random.uniform(k3, (D, D), minval=-bound, maxval=bound, dtype=jnp.float32)
    wk2 = jax.random.uniform(k4, (D, D), minval=-bound, maxval=bound, dtype=jnp.float32)

    sat_out, mir_out = mirror_aggregator(
        mirror_nodes, satellite_nodes, satellite_node_mask, wq1, wk1, wq2, wk2)
    jax.block_until_ready((sat_out, mir_out))

    sat_ref, mir_ref = _reference(
        mirror_nodes, satellite_nodes, satellite_node_mask, wq1, wk1, wq2, wk2)
    # sat path: only weight-fusion / summation-order rounding -> tight tolerance.
    assert jnp.allclose(sat_out, sat_ref, atol=5e-4, rtol=5e-4)
    # mir path additionally uses the EUP approx reciprocal in the softmax
    # denominator -> slightly looser tolerance.
    assert jnp.allclose(mir_out, mir_ref, atol=2e-3, rtol=2e-3)

    print("KERNEL_OK")
</pallas_src>

<mosaic_0001>
module attributes {stable_mosaic.version = 11 : i64} {
  func.func @_mirror_agg_kernel(%arg0: i32, %arg1: memref<2x256xf32, #tpu.memory_space<vmem>>, %arg2: memref<2x256xf32, #tpu.memory_space<vmem>>, %arg3: memref<2x8xi32, #tpu.memory_space<vmem>>, %arg4: memref<256x256xf32, #tpu.memory_space<vmem>>, %arg5: memref<256x256xf32, #tpu.memory_space<vmem>>, %arg6: memref<256x256xf32, #tpu.memory_space<vmem>>, %arg7: memref<2x256xf32, #tpu.memory_space<vmem>>, %arg8: memref<2x256xf32, #tpu.memory_space<vmem>>) attributes {dimension_semantics = [#tpu.dimension_semantics<parallel>], iteration_bounds = array<i64: 1>, scalar_prefetch = 0 : i64, scratch_operands = 0 : i64, tpu.core_type = #tpu.core_type<tc>, window_params = [{transform_indices = @transform_0, window_bounds = array<i64: 2, 256>}, {transform_indices = @transform_1, window_bounds = array<i64: 2, 256>}, {transform_indices = @transform_2, window_bounds = array<i64: 2, 8>}, {pipeline_mode = #tpu.pipeline_mode<synchronous>, transform_indices = @transform_3, window_bounds = array<i64: 256, 256>}, {pipeline_mode = #tpu.pipeline_mode<synchronous>, transform_indices = @transform_4, window_bounds = array<i64: 256, 256>}, {pipeline_mode = #tpu.pipeline_mode<synchronous>, transform_indices = @transform_5, window_bounds = array<i64: 256, 256>}, {transform_indices = @transform_6, window_bounds = array<i64: 2, 256>}, {transform_indices = @transform_7, window_bounds = array<i64: 2, 256>}]} {
    %c0 = arith.constant 0 : index
    %c0_0 = arith.constant 0 : index
    %0 = vector.load %arg1[%c0, %c0_0] : memref<2x256xf32, #tpu.memory_space<vmem>>, vector<2x256xf32>
    %c0_1 = arith.constant 0 : index
    %c0_2 = arith.constant 0 : index
    %1 = vector.load %arg2[%c0_1, %c0_2] : memref<2x256xf32, #tpu.memory_space<vmem>>, vector<2x256xf32>
    %c0_3 = arith.constant 0 : index
    %c0_4 = arith.constant 0 : index
    %2 = vector.load %arg4[%c0_3, %c0_4] : memref<256x256xf32, #tpu.memory_space<vmem>>, vector<256x256xf32>
    %cst = arith.constant dense<0.000000e+00> : vector<2x256xf32>
    %3 = tpu.matmul %0, %2, %cst {dimension_numbers = #tpu.dot_dimension_numbers<[1], [0], [0], [1], [0, 0, 1, 1], [], []>} : vector<2x256xf32>, vector<256x256xf32>, vector<2x256xf32> -> vector<2x256xf32>
    %4 = arith.mulf %3, %1 : vector<2x256xf32>
    %c0_5 = arith.constant 0 : index
    %c0_6 = arith.constant 0 : index
    %5 = vector.load %arg6[%c0_5, %c0_6] : memref<256x256xf32, #tpu.memory_space<vmem>>, vector<256x256xf32>
    %cst_7 = arith.constant dense<0.000000e+00> : vector<2x256xf32>
    %6 = tpu.matmul %4, %5, %cst_7 {dimension_numbers = #tpu.dot_dimension_numbers<[1], [0], [0], [1], [0, 0, 1, 1], [], []>} : vector<2x256xf32>, vector<256x256xf32>, vector<2x256xf32> -> vector<2x256xf32>
    %7 = arith.subf %1, %0 : vector<2x256xf32>
    %8 = arith.mulf %6, %7 : vector<2x256xf32>
    %9 = arith.addf %0, %8 : vector<2x256xf32>
    %c0_8 = arith.constant 0 : index
    %c0_9 = arith.constant 0 : index
    %10 = vector.load %arg7[%c0_8, %c0_9] : memref<2x256xf32, #tpu.memory_space<vmem>>, vector<2x256xf32>
    tpu.vector_store %arg7[%c0_8, %c0_9], %9 {strides = array<i32>} : memref<2x256xf32, #tpu.memory_space<vmem>>, vector<2x256xf32>,
    %c0_10 = arith.constant 0 : index
    %c0_11 = arith.constant 0 : index
    %11 = vector.load %arg5[%c0_10, %c0_11] : memref<256x256xf32, #tpu.memory_space<vmem>>, vector<256x256xf32>
    %cst_12 = arith.constant dense<0.000000e+00> : vector<2x256xf32>
    %12 = tpu.matmul %1, %11, %cst_12 {dimension_numbers = #tpu.dot_dimension_numbers<[1], [0], [0], [1], [0, 0, 1, 1], [], []>} : vector<2x256xf32>, vector<256x256xf32>, vector<2x256xf32> -> vector<2x256xf32>
    %13 = vector.shape_cast %12 : vector<2x256xf32> to vector<2x8x32xf32>
    %14 = vector.extract_strided_slice %9 {offsets = [0, 0], sizes = [2, 32], strides = [1, 1]} : vector<2x256xf32> to vector<2x32xf32>
    %15 = vector.shape_cast %14 : vector<2x32xf32> to vector<2x1x32xf32>
    %16 = vector.broadcast %15 : vector<2x1x32xf32> to vector<2x8x32xf32>
    %17 = arith.mulf %13, %16 : vector<2x8x32xf32>
    %cst_13 = arith.constant dense<0.000000e+00> : vector<2x8xf32>
    %18 = vector.multi_reduction <add>, %17, %cst_13 [2] : vector<2x8x32xf32> to vector<2x8xf32>
    %19 = vector.shape_cast %18 : vector<2x8xf32> to vector<2x8x1xf32>
    %20 = vector.extract_strided_slice %9 {offsets = [0, 32], sizes = [2, 32], strides = [1, 1]} : vector<2x256xf32> to vector<2x32xf32>
    %21 = vector.shape_cast %20 : vector<2x32xf32> to vector<2x1x32xf32>
    %22 = vector.broadcast %21 : vector<2x1x32xf32> to vector<2x8x32xf32>
    %23 = arith.mulf %13, %22 : vector<2x8x32xf32>
    %cst_14 = arith.constant dense<0.000000e+00> : vector<2x8xf32>
    %24 = vector.multi_reduction <add>, %23, %cst_14 [2] : vector<2x8x32xf32> to vector<2x8xf32>
    %25 = vector.shape_cast %24 : vector<2x8xf32> to vector<2x8x1xf32>
    %26 = vector.extract_strided_slice %9 {offsets = [0, 64], sizes = [2, 32], strides = [1, 1]} : vector<2x256xf32> to vector<2x32xf32>
    %27 = vector.shape_cast %26 : vector<2x32xf32> to vector<2x1x32xf32>
    %28 = vector.broadcast %27 : vector<2x1x32xf32> to vector<2x8x32xf32>
    %29 = arith.mulf %13, %28 : vector<2x8x32xf32>
    %cst_15 = arith.constant dense<0.000000e+00> : vector<2x8xf32>
    %30 = vector.multi_reduction <add>, %29, %cst_15 [2] : vector<2x8x32xf32> to vector<2x8xf32>
    %31 = vector.shape_cast %30 : vector<2x8xf32> to vector<2x8x1xf32>
    %32 = vector.extract_strided_slice %9 {offsets = [0, 96], sizes = [2, 32], strides = [1, 1]} : vector<2x256xf32> to vector<2x32xf32>
    %33 = vector.shape_cast %32 : vector<2x32xf32> to vector<2x1x32xf32>
    %34 = vector.broadcast %33 : vector<2x1x32xf32> to vector<2x8x32xf32>
    %35 = arith.mulf %13, %34 : vector<2x8x32xf32>
    %cst_16 = arith.constant dense<0.000000e+00> : vector<2x8xf32>
    %36 = vector.multi_reduction <add>, %35, %cst_16 [2] : vector<2x8x32xf32> to vector<2x8xf32>
    %37 = vector.shape_cast %36 : vector<2x8xf32> to vector<2x8x1xf32>
    %38 = vector.extract_strided_slice %9 {offsets = [0, 128], sizes = [2, 32], strides = [1, 1]} : vector<2x256xf32> to vector<2x32xf32>
    %39 = vector.shape_cast %38 : vector<2x32xf32> to vector<2x1x32xf32>
    %40 = vector.broadcast %39 : vector<2x1x32xf32> to vector<2x8x32xf32>
    %41 = arith.mulf %13, %40 : vector<2x8x32xf32>
    %cst_17 = arith.constant dense<0.000000e+00> : vector<2x8xf32>
    %42 = vector.multi_reduction <add>, %41, %cst_17 [2] : vector<2x8x32xf32> to vector<2x8xf32>
    %43 = vector.shape_cast %42 : vector<2x8xf32> to vector<2x8x1xf32>
    %44 = vector.extract_strided_slice %9 {offsets = [0, 160], sizes = [2, 32], strides = [1, 1]} : vector<2x256xf32> to vector<2x32xf32>
    %45 = vector.shape_cast %44 : vector<2x32xf32> to vector<2x1x32xf32>
    %46 = vector.broadcast %45 : vector<2x1x32xf32> to vector<2x8x32xf32>
    %47 = arith.mulf %13, %46 : vector<2x8x32xf32>
    %cst_18 = arith.constant dense<0.000000e+00> : vector<2x8xf32>
    %48 = vector.multi_reduction <add>, %47, %cst_18 [2] : vector<2x8x32xf32> to vector<2x8xf32>
    %49 = vector.shape_cast %48 : vector<2x8xf32> to vector<2x8x1xf32>
    %50 = vector.extract_strided_slice %9 {offsets = [0, 192], sizes = [2, 32], strides = [1, 1]} : vector<2x256xf32> to vector<2x32xf32>
    %51 = vector.shape_cast %50 : vector<2x32xf32> to vector<2x1x32xf32>
    %52 = vector.broadcast %51 : vector<2x1x32xf32> to vector<2x8x32xf32>
    %53 = arith.mulf %13, %52 : vector<2x8x32xf32>
    %cst_19 = arith.constant dense<0.000000e+00> : vector<2x8xf32>
    %54 = vector.multi_reduction <add>, %53, %cst_19 [2] : vector<2x8x32xf32> to vector<2x8xf32>
    %55 = vector.shape_cast %54 : vector<2x8xf32> to vector<2x8x1xf32>
    %56 = vector.extract_strided_slice %9 {offsets = [0, 224], sizes = [2, 32], strides = [1, 1]} : vector<2x256xf32> to vector<2x32xf32>
    %57 = vector.shape_cast %56 : vector<2x32xf32> to vector<2x1x32xf32>
    %58 = vector.broadcast %57 : vector<2x1x32xf32> to vector<2x8x32xf32>
    %59 = arith.mulf %13, %58 : vector<2x8x32xf32>
    %cst_20 = arith.constant dense<0.000000e+00> : vector<2x8xf32>
    %60 = vector.multi_reduction <add>, %59, %cst_20 [2] : vector<2x8x32xf32> to vector<2x8xf32>
    %61 = vector.shape_cast %60 : vector<2x8xf32> to vector<2x8x1xf32>
    %62 = tpu.concatenate %19, %25, %31, %37, %43, %49, %55, %61 in 2 : vector<2x8x1xf32>, vector<2x8x1xf32>, vector<2x8x1xf32>, vector<2x8x1xf32>, vector<2x8x1xf32>, vector<2x8x1xf32>, vector<2x8x1xf32>, vector<2x8x1xf32> -> vector<2x8x8xf32>
    %c0_21 = arith.constant 0 : index
    %c0_22 = arith.constant 0 : index
    %63 = vector.load %arg3[%c0_21, %c0_22] : memref<2x8xi32, #tpu.memory_space<vmem>>, vector<2x8xi32>
    %c0_i32 = arith.constant 0 : i32
    %64 = vector.broadcast %c0_i32 : i32 to vector<2x8xi32>
    %65 = arith.cmpi ne, %63, %64 : vector<2x8xi32>
    %66 = vector.shape_cast %65 : vector<2x8xi1> to vector<2x1x8xi1>
    %cst_23 = arith.constant -1.000000e+30 : f32
    %67 = vector.shape_cast %66 : vector<2x1x8xi1> to vector<2x1x8xi1>
    %68 = vector.broadcast %67 : vector<2x1x8xi1> to vector<2x8x8xi1>
    %69 = vector.broadcast %cst_23 : f32 to vector<2x8x8xf32>
    %70 = arith.select %68, %62, %69 : vector<2x8x8xi1>, vector<2x8x8xf32>
    %cst_24 = arith.constant dense<0xFF800000> : vector<2x8xf32>
    %71 = vector.multi_reduction <maximumf>, %70, %cst_24 [2] : vector<2x8x8xf32> to vector<2x8xf32>
    %72 = vector.shape_cast %71 : vector<2x8xf32> to vector<2x8x1xf32>
    %73 = vector.broadcast %72 : vector<2x8x1xf32> to vector<2x8x8xf32>
    %74 = arith.subf %70, %73 : vector<2x8x8xf32>
    %75 = math.exp %74 : vector<2x8x8xf32>
    %cst_25 = arith.constant dense<0.000000e+00> : vector<2x8xf32>
    %76 = vector.multi_reduction <add>, %75, %cst_25 [2] : vector<2x8x8xf32> to vector<2x8xf32>
    %77 = vector.shape_cast %76 : vector<2x8xf32> to vector<2x8x1xf32>
    %78 = tpu.reciprocal %77 {approx = true} : vector<2x8x1xf32> -> vector<2x8x1xf32>
    %cst_26 = arith.constant 0.000000e+00 : f32
    %79 = vector.broadcast %cst_26 : f32 to vector<2x8x32xf32>
    %80 = vector.extract_strided_slice %1 {offsets = [0, 0], sizes = [2, 32], strides = [1, 1]} : vector<2x256xf32> to vector<2x32xf32>
    %81 = vector.shape_cast %80 : vector<2x32xf32> to vector<2x1x32xf32>
    %82 = vector.extract_strided_slice %75 {offsets = [0, 0, 0], sizes = [2, 8, 1], strides = [1, 1, 1]} : vector<2x8x8xf32> to vector<2x8x1xf32>
    %83 = vector.shape_cast %82 : vector<2x8x1xf32> to vector<2x8xf32>
    %84 = vector.shape_cast %83 : vector<2x8xf32> to vector<2x8x1xf32>
    %85 = vector.broadcast %84 : vector<2x8x1xf32> to vector<2x8x32xf32>
    %86 = vector.broadcast %81 : vector<2x1x32xf32> to vector<2x8x32xf32>
    %87 = arith.mulf %85, %86 : vector<2x8x32xf32>
    %88 = arith.addf %79, %87 : vector<2x8x32xf32>
    %89 = vector.extract_strided_slice %1 {offsets = [0, 32], sizes = [2, 32], strides = [1, 1]} : vector<2x256xf32> to vector<2x32xf32>
    %90 = vector.shape_cast %89 : vector<2x32xf32> to vector<2x1x32xf32>
    %91 = vector.extract_strided_slice %75 {offsets = [0, 0, 1], sizes = [2, 8, 1], strides = [1, 1, 1]} : vector<2x8x8xf32> to vector<2x8x1xf32>
    %92 = vector.shape_cast %91 : vector<2x8x1xf32> to vector<2x8xf32>
    %93 = vector.shape_cast %92 : vector<2x8xf32> to vector<2x8x1xf32>
    %94 = vector.broadcast %93 : vector<2x8x1xf32> to vector<2x8x32xf32>
    %95 = vector.broadcast %90 : vector<2x1x32xf32> to vector<2x8x32xf32>
    %96 = arith.mulf %94, %95 : vector<2x8x32xf32>
    %97 = arith.addf %88, %96 : vector<2x8x32xf32>
    %98 = vector.extract_strided_slice %1 {offsets = [0, 64], sizes = [2, 32], strides = [1, 1]} : vector<2x256xf32> to vector<2x32xf32>
    %99 = vector.shape_cast %98 : vector<2x32xf32> to vector<2x1x32xf32>
    %100 = vector.extract_strided_slice %75 {offsets = [0, 0, 2], sizes = [2, 8, 1], strides = [1, 1, 1]} : vector<2x8x8xf32> to vector<2x8x1xf32>
    %101 = vector.shape_cast %100 : vector<2x8x1xf32> to vector<2x8xf32>
    %102 = vector.shape_cast %101 : vector<2x8xf32> to vector<2x8x1xf32>
    %103 = vector.broadcast %102 : vector<2x8x1xf32> to vector<2x8x32xf32>
    %104 = vector.broadcast %99 : vector<2x1x32xf32> to vector<2x8x32xf32>
    %105 = arith.mulf %103, %104 : vector<2x8x32xf32>
    %106 = arith.addf %97, %105 : vector<2x8x32xf32>
    %107 = vector.extract_strided_slice %1 {offsets = [0, 96], sizes = [2, 32], strides = [1, 1]} : vector<2x256xf32> to vector<2x32xf32>
    %108 = vector.shape_cast %107 : vector<2x32xf32> to vector<2x1x32xf32>
    %109 = vector.extract_strided_slice %75 {offsets = [0, 0, 3], sizes = [2, 8, 1], strides = [1, 1, 1]} : vector<2x8x8xf32> to vector<2x8x1xf32>
    %110 = vector.shape_cast %109 : vector<2x8x1xf32> to vector<2x8xf32>
    %111 = vector.shape_cast %110 : vector<2x8xf32> to vector<2x8x1xf32>
    %112 = vector.broadcast %111 : vector<2x8x1xf32> to vector<2x8x32xf32>
    %113 = vector.broadcast %108 : vector<2x1x32xf32> to vector<2x8x32xf32>
    %114 = arith.mulf %112, %113 : vector<2x8x32xf32>
    %115 = arith.addf %106, %114 : vector<2x8x32xf32>
    %116 = vector.extract_strided_slice %1 {offsets = [0, 128], sizes = [2, 32], strides = [1, 1]} : vector<2x256xf32> to vector<2x32xf32>
    %117 = vector.shape_cast %116 : vector<2x32xf32> to vector<2x1x32xf32>
    %118 = vector.extract_strided_slice %75 {offsets = [0, 0, 4], sizes = [2, 8, 1], strides = [1, 1, 1]} : vector<2x8x8xf32> to vector<2x8x1xf32>
    %119 = vector.shape_cast %118 : vector<2x8x1xf32> to vector<2x8xf32>
    %120 = vector.shape_cast %119 : vector<2x8xf32> to vector<2x8x1xf32>
    %121 = vector.broadcast %120 : vector<2x8x1xf32> to vector<2x8x32xf32>
    %122 = vector.broadcast %117 : vector<2x1x32xf32> to vector<2x8x32xf32>
    %123 = arith.mulf %121, %122 : vector<2x8x32xf32>
    %124 = arith.addf %115, %123 : vector<2x8x32xf32>
    %125 = vector.extract_strided_slice %1 {offsets = [0, 160], sizes = [2, 32], strides = [1, 1]} : vector<2x256xf32> to vector<2x32xf32>
    %126 = vector.shape_cast %125 : vector<2x32xf32> to vector<2x1x32xf32>
    %127 = vector.extract_strided_slice %75 {offsets = [0, 0, 5], sizes = [2, 8, 1], strides = [1, 1, 1]} : vector<2x8x8xf32> to vector<2x8x1xf32>
    %128 = vector.shape_cast %127 : vector<2x8x1xf32> to vector<2x8xf32>
    %129 = vector.shape_cast %128 : vector<2x8xf32> to vector<2x8x1xf32>
    %130 = vector.broadcast %129 : vector<2x8x1xf32> to vector<2x8x32xf32>
    %131 = vector.broadcast %126 : vector<2x1x32xf32> to vector<2x8x32xf32>
    %132 = arith.mulf %130, %131 : vector<2x8x32xf32>
    %133 = arith.addf %124, %132 : vector<2x8x32xf32>
    %134 = vector.extract_strided_slice %1 {offsets = [0, 192], sizes = [2, 32], strides = [1, 1]} : vector<2x256xf32> to vector<2x32xf32>
    %135 = vector.shape_cast %134 : vector<2x32xf32> to vector<2x1x32xf32>
    %136 = vector.extract_strided_slice %75 {offsets = [0, 0, 6], sizes = [2, 8, 1], strides = [1, 1, 1]} : vector<2x8x8xf32> to vector<2x8x1xf32>
    %137 = vector.shape_cast %136 : vector<2x8x1xf32> to vector<2x8xf32>
    %138 = vector.shape_cast %137 : vector<2x8xf32> to vector<2x8x1xf32>
    %139 = vector.broadcast %138 : vector<2x8x1xf32> to vector<2x8x32xf32>
    %140 = vector.broadcast %135 : vector<2x1x32xf32> to vector<2x8x32xf32>
    %141 = arith.mulf %139, %140 : vector<2x8x32xf32>
    %142 = arith.addf %133, %141 : vector<2x8x32xf32>
    %143 = vector.extract_strided_slice %1 {offsets = [0, 224], sizes = [2, 32], strides = [1, 1]} : vector<2x256xf32> to vector<2x32xf32>
    %144 = vector.shape_cast %143 : vector<2x32xf32> to vector<2x1x32xf32>
    %145 = vector.extract_strided_slice %75 {offsets = [0, 0, 7], sizes = [2, 8, 1], strides = [1, 1, 1]} : vector<2x8x8xf32> to vector<2x8x1xf32>
    %146 = vector.shape_cast %145 : vector<2x8x1xf32> to vector<2x8xf32>
    %147 = vector.shape_cast %146 : vector<2x8xf32> to vector<2x8x1xf32>
    %148 = vector.broadcast %147 : vector<2x8x1xf32> to vector<2x8x32xf32>
    %149 = vector.broadcast %144 : vector<2x1x32xf32> to vector<2x8x32xf32>
    %150 = arith.mulf %148, %149 : vector<2x8x32xf32>
    %151 = arith.addf %142, %150 : vector<2x8x32xf32>
    %152 = vector.broadcast %78 : vector<2x8x1xf32> to vector<2x8x32xf32>
    %153 = arith.mulf %151, %152 : vector<2x8x32xf32>
    %154 = vector.shape_cast %153 : vector<2x8x32xf32> to vector<2x256xf32>
    %c0_27 = arith.constant 0 : index
    %c0_28 = arith.constant 0 : index
    %155 = vector.load %arg8[%c0_27, %c0_28] : memref<2x256xf32, #tpu.memory_space<vmem>>, vector<2x256xf32>
    tpu.vector_store %arg8[%c0_27, %c0_28], %154 {strides = array<i32>} : memref<2x256xf32, #tpu.memory_space<vmem>>, vector<2x256xf32>,
    return
  }
  func.func @transform_0(%arg0: i32) -> (i32, i32) {
    %c0_i32 = arith.constant 0 : i32
    %c0_i32_0 = arith.constant 0 : i32
    return %arg0, %c0_i32 : i32, i32
  }
  func.func @transform_1(%arg0: i32) -> (i32, i32) {
    %c0_i32 = arith.constant 0 : i32
    %c0_i32_0 = arith.constant 0 : i32
    return %arg0, %c0_i32 : i32, i32
  }
  func.func @transform_2(%arg0: i32) -> (i32, i32) {
    %c0_i32 = arith.constant 0 : i32
    %c0_i32_0 = arith.constant 0 : i32
    return %arg0, %c0_i32 : i32, i32
  }
  func.func @transform_3(%arg0: i32) -> (i32, i32) {
    %c0_i32 = arith.constant 0 : i32
    %c0_i32_0 = arith.constant 0 : i32
    %c0_i32_1 = arith.constant 0 : i32
    return %c0_i32, %c0_i32_0 : i32, i32
  }
  func.func @transform_4(%arg0: i32) -> (i32, i32) {
    %c0_i32 = arith.constant 0 : i32
    %c0_i32_0 = arith.constant 0 : i32
    %c0_i32_1 = arith.constant 0 : i32
    return %c0_i32, %c0_i32_0 : i32, i32
  }
  func.func @transform_5(%arg0: i32) -> (i32, i32) {
    %c0_i32 = arith.constant 0 : i32
    %c0_i32_0 = arith.constant 0 : i32
    %c0_i32_1 = arith.constant 0 : i32
    return %c0_i32, %c0_i32_0 : i32, i32
  }
  func.func @transform_6(%arg0: i32) -> (i32, i32) {
    %c0_i32 = arith.constant 0 : i32
    %c0_i32_0 = arith.constant 0 : i32
    return %arg0, %c0_i32 : i32, i32
  }
  func.func @transform_7(%arg0: i32) -> (i32, i32) {
    %c0_i32 = arith.constant 0 : i32
    %c0_i32_0 = arith.constant 0 : i32
    return %arg0, %c0_i32 : i32, i32
  }
}

</mosaic_0001>

<bundles_post_ra>
// kernel: tpu_custom_call.1
= control target key start
LH: loop header
LB: loop body
LE: loop exit
PB: predicated region body
PF: predicated region fallthrough
CT: control target
= control target key end

     0   :  { %13 = vsyncpa [#allocation3], 0  ;;  %s1975_s0 = inlined_call_operand.hbm [shape: f32[2,256], index: 0, kind: input, shape index: {}]   ;;  %s1976_s1 = inlined_call_operand.hbm [shape: f32[2,256], index: 1, kind: input, shape index: {}]   ;;  %s1977_s2 = inlined_call_operand.vmem [shape: s32[2,8], index: 2, kind: input, shape index: {}]   ;;  %s1978_s3 = inlined_call_operand.hbm [shape: f32[256,256], index: 3, kind: input, shape index: {}]   ;;  %s1979_s4 = inlined_call_operand.hbm [shape: f32[256,256], index: 4, kind: input, shape index: {}]   ;;  %s1980_s5 = inlined_call_operand.hbm [shape: f32[256,256], index: 5, kind: input, shape index: {}]   ;;  %s1981_s6 = inlined_call_operand.hbm [shape: f32[2,256], index: 6, kind: output, shape index: {0}]   ;;  %s1982_s7 = inlined_call_operand.hbm [shape: f32[2,256], index: 7, kind: output, shape index: {1}]  }
   0x1   :  { %14 = vsyncpa [#allocation6], 0 }
   0x2   :  { %15 = vsyncpa [#allocation9], 0 }
   0x3   :  { %16 = vsyncpa [#allocation4], 0 }
   0x4   :  { %17 = vsyncpa [#allocation13], 0  ;;  %s1612_s24 = smov [#allocation5]   ;;  %s1448_s28 = scalar_lea.hbm %s1976_s1, 64 }
   0x5   :  { %s34_s25 = sshll.u32 %s1612_s24, 4  ;;  %p1449_p0 = scmp.ne.s32.totalorder %s1976_s1, %s1448_s28  ;;  %s35_s25 = int_to_ptr.vmem [resolvable:$true] %s34_s25 }
   0x6   :  { %p1452_p1 = scmp.lt.u32.totalorder %s1448_s28, %s1976_s1 }
   0x8   :  { %p1454_p2 = pnand %p1452_p1, %p1449_p0 }
   0xa   :  { %1457 = shalt.err (!%p1454_p2)
}
   0xb   :  { %s1458_s10 = scalar_lea.vmem %s35_s25, 64  ;;  %p1463_p4 = scmp.lt.s32.totalorder %s35_s25, %s35_s25 }
   0xc   :  { %p1459_p3 = scmp.ne.s32.totalorder %s35_s25, %s1458_s10  ;;  %p1464_p5 = scmp.lt.s32.totalorder %s1458_s10, %s1458_s10 }
   0xe   :  { %p1465_p6 = por %p1464_p5, %p1463_p4 }
  0x10   :  { %p1466_p7 = pnand %p1465_p6, %p1459_p3 }
  0x12   :  { %1469 = shalt.err (!%p1466_p7)
}
  0x13   :  { %37 = dma.hbm_to_vmem [thread:$0]  %s1976_s1, 64, %s35_s25, [#allocation6]  }
  0x14   :  { %s1613_s13 = smov [#allocation8]   ;;  %s1614_s15 = smov [#allocation2]  }
  0x15   :  { %s57_s14 = sshll.u32 %s1613_s13, 4  ;;  %s24_s16 = sshll.u32 %s1614_s15, 4  ;;  %s58_s14 = int_to_ptr.vmem [resolvable:$true] %s57_s14  ;;  %s25_s16 = int_to_ptr.vmem [resolvable:$true] %s24_s16 }
  0x16   :  { %s1470_s19 = scalar_lea.hbm %s1979_s4, 8192 }
  0x17   :  { %p1471_p8 = scmp.ne.s32.totalorder %s1979_s4, %s1470_s19  ;;  %p1474_p9 = scmp.lt.u32.totalorder %s1470_s19, %s1979_s4 }
  0x19   :  { %p1476_p10 = pnand %p1474_p9, %p1471_p8 }
  0x1b   :  { %1479 = shalt.err (!%p1476_p10)
}
  0x1c   :  { %s1480_s1 = scalar_lea.vmem %s58_s14, 8192  ;;  %p1485_p12 = scmp.lt.s32.totalorder %s58_s14, %s58_s14 }
  0x1d   :  { %p1481_p11 = scmp.ne.s32.totalorder %s58_s14, %s1480_s1  ;;  %p1486_p13 = scmp.lt.s32.totalorder %s1480_s1, %s1480_s1 }
  0x1f   :  { %p1487_p0 = por %p1486_p13, %p1485_p12 }
  0x21   :  { %p1488_p1 = pnand %p1487_p0, %p1481_p11 }
  0x23   :  { %1491 = shalt.err (!%p1488_p1)
}
  0x24   :  { %s1615_s24 = smov 256   ;;  %s1616_s25 = smov 16  }
  0x25   :  { %63 = dma.hbm_to_vmem [thread:$0]  %s1979_s4, 8192, %s58_s14, [#allocation9], %s1615_s24, %s1615_s24, %s1616_s25  }
  0x26   :  { %s1492_s30 = scalar_lea.hbm %s1975_s0, 64 }
  0x27   :  { %p1493_p2 = scmp.ne.s32.totalorder %s1975_s0, %s1492_s30  ;;  %p1496_p3 = scmp.lt.u32.totalorder %s1492_s30, %s1975_s0 }
  0x29   :  { %p1498_p4 = pnand %p1496_p3, %p1493_p2 }
  0x2b   :  { %1501 = shalt.err (!%p1498_p4)
}
  0x2c   :  { %s1502_s12 = scalar_lea.vmem %s25_s16, 64  ;;  %p1507_p6 = scmp.lt.s32.totalorder %s25_s16, %s25_s16 }
  0x2d   :  { %p1503_p5 = scmp.ne.s32.totalorder %s25_s16, %s1502_s12  ;;  %p1508_p7 = scmp.lt.s32.totalorder %s1502_s12, %s1502_s12 }
  0x2f   :  { %p1509_p8 = por %p1508_p7, %p1507_p6 }
  0x31   :  { %p1510_p9 = pnand %p1509_p8, %p1503_p5 }
  0x33   :  { %1513 = shalt.err (!%p1510_p9)
}
  0x34   :  { %27 = dma.hbm_to_vmem [thread:$0]  %s1975_s0, 64, %s25_s16, [#allocation3]  }
  0x35   :  { %s1617_s14 = smov [#allocation7]   ;;  %s1618_s17 = smov [#allocation10]  }
  0x36   :  { %s45_s15 = sshll.u32 %s1617_s14, 4  ;;  %s69_s18 = sshll.u32 %s1618_s17, 4  ;;  %s46_s15 = int_to_ptr.vmem [resolvable:$true] %s45_s15  ;;  %s70_s18 = int_to_ptr.vmem [resolvable:$true] %s69_s18 }
  0x37   :  { %s1514_s21 = scalar_lea.hbm %s1978_s3, 8192 }
  0x38   :  { %p1515_p10 = scmp.ne.s32.totalorder %s1978_s3, %s1514_s21  ;;  %p1518_p11 = scmp.lt.u32.totalorder %s1514_s21, %s1978_s3 }
  0x3a   :  { %p1520_p12 = pnand %p1518_p11, %p1515_p10 }
  0x3c   :  { %1523 = shalt.err (!%p1520_p12)
}
  0x3d   :  { %s1524_s0 = scalar_lea.vmem %s46_s15, 8192  ;;  %p1529_p0 = scmp.lt.s32.totalorder %s46_s15, %s46_s15 }
  0x3e   :  { %p1525_p13 = scmp.ne.s32.totalorder %s46_s15, %s1524_s0  ;;  %p1530_p1 = scmp.lt.s32.totalorder %s1524_s0, %s1524_s0 }
  0x40   :  { %p1531_p2 = por %p1530_p1, %p1529_p0 }
  0x42   :  { %p1532_p3 = pnand %p1531_p2, %p1525_p13 }
  0x44   :  { %1535 = shalt.err (!%p1532_p3)
}
  0x45   :  { %51 = dma.hbm_to_vmem [thread:$0]  %s1978_s3, 8192, %s46_s15, [#allocation6], %s1615_s24, %s1615_s24, %s1616_s25  }
  0x46   :  { %s1536_s30 = scalar_lea.hbm %s1980_s5, 8192 }
  0x47   :  { %p1537_p4 = scmp.ne.s32.totalorder %s1980_s5, %s1536_s30  ;;  %p1540_p5 = scmp.lt.u32.totalorder %s1536_s30, %s1980_s5 }
  0x49   :  { %p1542_p6 = pnand %p1540_p5, %p1537_p4 }
  0x4b   :  { %1545 = shalt.err (!%p1542_p6)
}
  0x4c   :  { %s1546_s12 = scalar_lea.vmem %s70_s18, 8192  ;;  %p1551_p8 = scmp.lt.s32.totalorder %s70_s18, %s70_s18 }
  0x4d   :  { %p1547_p7 = scmp.ne.s32.totalorder %s70_s18, %s1546_s12  ;;  %p1552_p9 = scmp.lt.s32.totalorder %s1546_s12, %s1546_s12 }
  0x4f   :  { %p1553_p10 = por %p1552_p9, %p1551_p8 }
  0x51   :  { %p1554_p11 = pnand %p1553_p10, %p1547_p7 }
  0x53   :  { %1557 = shalt.err (!%p1554_p11)
}
  0x54   :  { %75 = dma.hbm_to_vmem [thread:$0]  %s1980_s5, 8192, %s70_s18, [#allocation9], %s1615_s24, %s1615_s24, %s1616_s25  }
  0x55   :  { %1602 = dma.done.wait [#allocation3], 64  }
  0x56   :  { %1603 = vsyncadd [#allocation3], 4294967232 }
  0x57   :  { %1604 = dma.done.wait [#allocation6], 8256  }
  0x58   :  { %1605 = vsyncadd [#allocation6], 4294959040 }
  0x59   :  { %1606 = dma.done.wait [#allocation9], 16384  }
  0x5a   :  { %1607 = vsyncadd [#allocation9], 4294950912  ;;  %v94_v0 = vld [vmem:[#allocation7 + $0x8] sm:$0xff]  ;;  %v96_v1 = vld [vmem:[#allocation7 + $0x18] sm:$0xff]  ;;  %v1619_v25 = vmov 1983009808   ;;  %v161_v27 = vlaneseq }
  0x5b   :  { %v93_v2 = vld [vmem:[#allocation7] sm:$0xff]  ;;  %v1208_v3 = vpack.c.bf16 %v96_v1, %v94_v0  ;;  %v95_v4 = vld [vmem:[#allocation7 + $0x10] sm:$0xff]  ;;  %v98_v5 = vld [vmem:[#allocation7 + $0x28] sm:$0xff]  ;;  %v159_v26 = vunpack.c.l.s4 %v1619_v25  ;;  %s1620_s5 = smov 32   ;;  %s1621_s24 = smov 96   ;;  %vm640_vm0 = vcmask 261120  }
  0x5c   :  { %v100_v6 = vld [vmem:[#allocation7 + $0x38] sm:$0xff]  ;;  %v1210_v7 = vpack.c.bf16 %v95_v4, %v93_v2  ;;  %v97_v9 = vld [vmem:[#allocation7 + $0x20] sm:$0xff]  ;;  %v99_v10 = vld [vmem:[#allocation7 + $0x30] sm:$0xff]  ;;  %v1745_v35 = vshrl.u32 %v161_v27, 7  ;;  %s1622_s25 = smov 64   ;;  %vm781_vm3 = vcmask 7168  }
  0x5d   :  { %v1212_v8 = vpack.c.bf16 %v100_v6, %v98_v5  ;;  %v102_v11 = vld [vmem:[#allocation7 + $0x48] sm:$0xff]  ;;  %1209 = vmatprep.subr.bf16.mxu0 %v1208_v3  ;;  %v104_v12 = vld [vmem:[#allocation7 + $0x58] sm:$0xff]  ;;  %v1214_v13 = vpack.c.bf16 %v99_v10, %v97_v9  ;;  %v101_v15 = vld [vmem:[#allocation7 + $0x40] sm:$0xff]  ;;  %v160_v34 = vunpack.c.0.s8 %v159_v26  ;;  %vm784_vm4 = vcmask 15360  }
  0x5e   :  { %1211 = vmatpush1.bf16.msra.mxu0 %v1210_v7  ;;  %v1216_v14 = vpack.c.bf16 %v104_v12, %v102_v11  ;;  %v103_v16 = vld [vmem:[#allocation7 + $0x50] sm:$0xff]  ;;  %v106_v17 = vld [vmem:[#allocation7 + $0x68] sm:$0xff]  ;;  %v108_v18 = vld [vmem:[#allocation7 + $0x78] sm:$0xff]  ;;  %vm787_vm5 = vcmask 23552   ;;  %vm790_vm7 = vcmask 31744   ;;  %vm793_vm8 = vcmask 39936  }
  0x5f   :  { %1213 = vmatprep.subr.bf16.mxu0 %v1212_v8  ;;  %v1218_v19 = vpack.c.bf16 %v103_v16, %v101_v15  ;;  %v1220_v20 = vpack.c.bf16 %v108_v18, %v106_v17  ;;  %v105_v21 = vld [vmem:[#allocation7 + $0x60] sm:$0xff]  ;;  %v107_v22 = vld [vmem:[#allocation7 + $0x70] sm:$0xff]  ;;  %v110_v23 = vld [vmem:[#allocation7 + $0x88] sm:$0xff]  ;;  %v1748_v42 = vsub.s32 %v160_v34, %v1745_v35  ;;  %vm796_vm9 = vcmask 48128  }
  0x60   :  { %v112_v24 = vld [vmem:[#allocation7 + $0x98] sm:$0xff]  ;;  %v1222_v28 = vpack.c.bf16 %v107_v22, %v105_v21  ;;  %v109_v30 = vld [vmem:[#allocation7 + $0x80] sm:$0xff]  ;;  %v111_v31 = vld [vmem:[#allocation7 + $0x90] sm:$0xff]  ;;  %vm799_vm10 = vcmask 56320   ;;  %vm843_vm12 = vcmask 64512  }
  0x61   :  { %v1224_v29 = vpack.c.bf16 %v112_v24, %v110_v23  ;;  %v114_v32 = vld [vmem:[#allocation7 + $0xa8] sm:$0xff]  ;;  %v116_v33 = vld [vmem:[#allocation7 + $0xb8] sm:$0xff]  ;;  %v1226_v36 = vpack.c.bf16 %v111_v31, %v109_v30  ;;  %v113_v38 = vld [vmem:[#allocation7 + $0xa0] sm:$0xff] }
  0x62   :  { %1215 = vmatpush1.bf16.msra.mxu0 %v1214_v13  ;;  %v1228_v37 = vpack.c.bf16 %v116_v33, %v114_v32  ;;  %v115_v39 = vld [vmem:[#allocation7 + $0xb0] sm:$0xff]  ;;  %v118_v40 = vld [vmem:[#allocation7 + $0xc8] sm:$0xff]  ;;  %v120_v41 = vld [vmem:[#allocation7 + $0xd8] sm:$0xff] }
  0x63   :  { %1217 = vmatprep.subr.bf16.mxu0 %v1216_v14  ;;  %v1230_v43 = vpack.c.bf16 %v115_v39, %v113_v38  ;;  %v1232_v44 = vpack.c.bf16 %v120_v41, %v118_v40  ;;  %v117_v45 = vld [vmem:[#allocation7 + $0xc0] sm:$0xff]  ;;  %v119_v46 = vld [vmem:[#allocation7 + $0xd0] sm:$0xff]  ;;  %v1750_v47 = vld [vmem:[#allocation2] sm:$0xf] }
  0x64   :  { %v122_v48 = vld [vmem:[#allocation7 + $0xe8] sm:$0xff]  ;;  %v124_v49 = vld [vmem:[#allocation7 + $0xf8] sm:$0xff]  ;;  %v1754_v50 = vrot.slane %v1750_v47, %v1748_v42  ;;  %v1234_v51 = vpack.c.bf16 %v119_v46, %v117_v45  ;;  %v121_v54 = vld [vmem:[#allocation7 + $0xe0] sm:$0xff] }
  0x65   :  { %v1236_v53 = vpack.c.bf16 %v124_v49, %v122_v48  ;;  %v123_v55 = vld [vmem:[#allocation7 + $0xf0] sm:$0xff]  ;;  %v126_v56 = vld [vmem:[#allocation7 + $0x108] sm:$0xff]  ;;  %v128_v57 = vld [vmem:[#allocation7 + $0x118] sm:$0xff] }
  0x66   :  { %1219 = vmatpush1.bf16.msra.mxu0 %v1218_v19  ;;  %v165_v52 = vcombine.high %v1754_v50, %v1754_v50  ;;  %v1238_v58 = vpack.c.bf16 %v123_v55, %v121_v54  ;;  %v1240_v59 = vpack.c.bf16 %v128_v57, %v126_v56  ;;  %v125_v60 = vld [vmem:[#allocation7 + $0x100] sm:$0xff]  ;;  %v127_v61 = vld [vmem:[#allocation7 + $0x110] sm:$0xff]  ;;  %v130_v62 = vld [vmem:[#allocation7 + $0x128] sm:$0xff] }
  0x67   :  { %1221 = vmatprep.subr.bf16.mxu0 %v1220_v20  ;;  %v132_v63 = vld [vmem:[#allocation7 + $0x138] sm:$0xff]  ;;  %v1242_v0 = vpack.c.bf16 %v127_v61, %v125_v60  ;;  %v129_v2 = vld [vmem:[#allocation7 + $0x120] sm:$0xff]  ;;  %v131_v3 = vld [vmem:[#allocation7 + $0x130] sm:$0xff] }
  0x68   :  { %232 = vmatprep.mubr.f32.mxu0 %v165_v52  ;;  %v1244_v1 = vpack.c.bf16 %v132_v63, %v130_v62  ;;  %v134_v4 = vld [vmem:[#allocation7 + $0x148] sm:$0xff]  ;;  %v136_v5 = vld [vmem:[#allocation7 + $0x158] sm:$0xff]  ;;  %v1246_v6 = vpack.c.bf16 %v131_v3, %v129_v2  ;;  %v133_v8 = vld [vmem:[#allocation7 + $0x140] sm:$0xff] }
  0x69   :  { %v1248_v7 = vpack.c.bf16 %v136_v5, %v134_v4  ;;  %v135_v9 = vld [vmem:[#allocation7 + $0x150] sm:$0xff]  ;;  %v138_v10 = vld [vmem:[#allocation7 + $0x168] sm:$0xff]  ;;  %v140_v11 = vld [vmem:[#allocation7 + $0x178] sm:$0xff] }
  0x6a   :  { %1223 = vmatpush1.bf16.msra.mxu0 %v1222_v28  ;;  %v1250_v12 = vpack.c.bf16 %v135_v9, %v133_v8  ;;  %v1252_v13 = vpack.c.bf16 %v140_v11, %v138_v10  ;;  %v137_v14 = vld [vmem:[#allocation7 + $0x160] sm:$0xff]  ;;  %v139_v15 = vld [vmem:[#allocation7 + $0x170] sm:$0xff]  ;;  %v142_v16 = vld [vmem:[#allocation7 + $0x188] sm:$0xff] }
  0x6b   :  { %1225 = vmatprep.subr.bf16.mxu0 %v1224_v29  ;;  %v144_v17 = vld [vmem:[#allocation7 + $0x198] sm:$0xff]  ;;  %v141_v18 = vld [vmem:[#allocation7 + $0x180] sm:$0xff]  ;;  %v143_v19 = vld [vmem:[#allocation7 + $0x190] sm:$0xff]  ;;  %v1254_v22 = vpack.c.bf16 %v139_v15, %v137_v14 }
  0x6c   :  { %v253_v20 = vld [vmem:[#allocation10 + $0x8] sm:$0xff]  ;;  %v255_v21 = vld [vmem:[#allocation10 + $0x18] sm:$0xff]  ;;  %v252_v25 = vld [vmem:[#allocation10] sm:$0xff]  ;;  %v1256_v28 = vpack.c.bf16 %v144_v17, %v142_v16  ;;  %v1258_v39 = vpack.c.bf16 %v143_v19, %v141_v18 }
  0x6d   :  { %v146_v23 = vld [vmem:[#allocation7 + $0x1a8] sm:$0xff]  ;;  %v1272_v24 = vpack.c.bf16 %v255_v21, %v253_v20  ;;  %v254_v26 = vld [vmem:[#allocation10 + $0x10] sm:$0xff]  ;;  %v259_v30 = vld [vmem:[#allocation10 + $0x38] sm:$0xff] }
  0x6e   :  { %1227 = vmatpush1.bf16.msra.mxu0 %v1226_v36  ;;  %v257_v27 = vld [vmem:[#allocation10 + $0x28] sm:$0xff]  ;;  %v1274_v29 = vpack.c.bf16 %v254_v26, %v252_v25  ;;  %v256_v31 = vld [vmem:[#allocation10 + $0x20] sm:$0xff]  ;;  %v258_v32 = vld [vmem:[#allocation10 + $0x30] sm:$0xff] }
  0x6f   :  { %1229 = vmatprep.subr.bf16.mxu0 %v1228_v37  ;;  %v148_v33 = vld [vmem:[#allocation7 + $0x1b8] sm:$0xff]  ;;  %1273 = vmatprep.subr.bf16.mxu1 %v1272_v24  ;;  %v1276_v34 = vpack.c.bf16 %v259_v30, %v257_v27  ;;  %v261_v36 = vld [vmem:[#allocation10 + $0x48] sm:$0xff]  ;;  %v1278_v38 = vpack.c.bf16 %v258_v32, %v256_v31  ;;  %v145_v40 = vld [vmem:[#allocation7 + $0x1a0] sm:$0xff] }
  0x70   :  { %v263_v37 = vld [vmem:[#allocation10 + $0x58] sm:$0xff]  ;;  %1275 = vmatpush1.bf16.msra.mxu1 %v1274_v29  ;;  %v1260_v45 = vpack.c.bf16 %v148_v33, %v146_v23  ;;  %v147_v46 = vld [vmem:[#allocation7 + $0x1b0] sm:$0xff]  ;;  %v265_v48 = vld [vmem:[#allocation10 + $0x68] sm:$0xff] }
  0x71   :  { %1277 = vmatprep.subr.bf16.mxu1 %v1276_v34  ;;  %v1280_v41 = vpack.c.bf16 %v263_v37, %v261_v36  ;;  %v267_v49 = vld [vmem:[#allocation10 + $0x78] sm:$0xff]  ;;  %v1262_v54 = vpack.c.bf16 %v147_v46, %v145_v40  ;;  %v149_v55 = vld [vmem:[#allocation7 + $0x1c0] sm:$0xff]  ;;  %v151_v60 = vld [vmem:[#allocation7 + $0x1d0] sm:$0xff] }
  0x72   :  { %1231 = vmatpush1.bf16.msra.mxu0 %v1230_v43  ;;  %v260_v43 = vld [vmem:[#allocation10 + $0x40] sm:$0xff]  ;;  %v152_v52 = vld [vmem:[#allocation7 + $0x1d8] sm:$0xff]  ;;  %v1284_v56 = vpack.c.bf16 %v267_v49, %v265_v48  ;;  %v269_v61 = vld [vmem:[#allocation10 + $0x88] sm:$0xff]  ;;  %v1266_v3 = vpack.c.bf16 %v151_v60, %v149_v55 }
  0x73   :  { %1233 = vmatprep.subr.bf16.mxu0 %v1232_v44  ;;  %v262_v44 = vld [vmem:[#allocation10 + $0x50] sm:$0xff]  ;;  %v264_v57 = vld [vmem:[#allocation10 + $0x60] sm:$0xff]  ;;  %v271_v62 = vld [vmem:[#allocation10 + $0x98] sm:$0xff] }
  0x74   :  { %1279 = vmatpush1.bf16.msra.mxu1 %v1278_v38  ;;  %v154_v63 = vld [vmem:[#allocation7 + $0x1e8] sm:$0xff]  ;;  %v155_v4 = vld [vmem:[#allocation7 + $0x1f0] sm:$0xff]  ;;  %v1288_v5 = vpack.c.bf16 %v271_v62, %v269_v61  ;;  %v1758_v9 = vld [vmem:[#allocation5] sm:$0xf] }
  0x75   :  { %1281 = vmatprep.subr.bf16.mxu1 %v1280_v41  ;;  %v273_v10 = vld [vmem:[#allocation10 + $0xa8] sm:$0xff]  ;;  %v275_v11 = vld [vmem:[#allocation10 + $0xb8] sm:$0xff]  ;;  %v1762_v16 = vrot.slane %v1758_v9, %v1748_v42  ;;  %v272_v18 = vld [vmem:[#allocation10 + $0xa0] sm:$0xff] }
  0x76   :  { %1235 = vmatpush1.bf16.msra.mxu0 %v1234_v51  ;;  %v150_v51 = vld [vmem:[#allocation7 + $0x1c8] sm:$0xff]  ;;  %v1292_v17 = vpack.c.bf16 %v275_v11, %v273_v10  ;;  %v274_v19 = vld [vmem:[#allocation10 + $0xb0] sm:$0xff]  ;;  %v414_v21 = vld [vmem:[#allocation8] sm:$0xff] }
  0x77   :  { %1237 = vmatprep.subr.bf16.mxu0 %v1236_v53  ;;  %v1282_v53 = vpack.c.bf16 %v262_v44, %v260_v43  ;;  %v419_v23 = vld [vmem:[#allocation8 + $0x28] sm:$0xff]  ;;  %v421_v24 = vld [vmem:[#allocation8 + $0x38] sm:$0xff]  ;;  %v1294_v27 = vpack.c.bf16 %v274_v19, %v272_v18  ;;  %v418_v29 = vld [vmem:[#allocation8 + $0x20] sm:$0xff]  ;;  %v1766_v30 = vcombine.high %v1762_v16, %v1762_v16 }
  0x78   :  { %v277_v25 = vld [vmem:[#allocation10 + $0xc8] sm:$0xff]  ;;  %v279_v26 = vld [vmem:[#allocation10 + $0xd8] sm:$0xff]  ;;  %v276_v31 = vld [vmem:[#allocation10 + $0xc0] sm:$0xff]  ;;  %v1340_v33 = vpack.c.bf16 %v421_v24, %v419_v23 }
  0x79   :  { %1283 = vmatpush1.bf16.msra.mxu1 %v1282_v53  ;;  %v278_v32 = vld [vmem:[#allocation10 + $0xd0] sm:$0xff]  ;;  %v1296_v36 = vpack.c.bf16 %v279_v26, %v277_v25  ;;  %v281_v37 = vld [vmem:[#allocation10 + $0xe8] sm:$0xff]  ;;  %v283_v38 = vld [vmem:[#allocation10 + $0xf8] sm:$0xff] }
  0x7a   :  { %1239 = vmatpush1.bf16.msra.mxu0 %v1238_v58  ;;  %v266_v58 = vld [vmem:[#allocation10 + $0x70] sm:$0xff]  ;;  %1285 = vmatprep.subr.bf16.mxu1 %v1284_v56  ;;  %v425_v40 = vld [vmem:[#allocation8 + $0x58] sm:$0xff]  ;;  %v1298_v41 = vpack.c.bf16 %v278_v32, %v276_v31  ;;  %v422_v44 = vld [vmem:[#allocation8 + $0x40] sm:$0xff] }
  0x7b   :  { %1241 = vmatprep.subr.bf16.mxu0 %v1240_v59  ;;  %v1264_v59 = vpack.c.bf16 %v152_v52, %v150_v51  ;;  %v1286_v2 = vpack.c.bf16 %v266_v58, %v264_v57  ;;  %v420_v34 = vld [vmem:[#allocation8 + $0x30] sm:$0xff]  ;;  %v280_v46 = vld [vmem:[#allocation10 + $0xe0] sm:$0xff]  ;;  %v285_v52 = vld [vmem:[#allocation10 + $0x108] sm:$0xff] }
  0x7c   :  { %v1342_v43 = vpack.c.bf16 %v420_v34, %v418_v29  ;;  %v282_v48 = vld [vmem:[#allocation10 + $0xf0] sm:$0xff]  ;;  %v287_v53 = vld [vmem:[#allocation10 + $0x118] sm:$0xff]  ;;  %v426_v57 = vld [vmem:[#allocation8 + $0x60] sm:$0xff] }
  0x7d   :  { %1287 = vmatpush1.bf16.msra.mxu1 %v1286_v2  ;;  %v424_v51 = vld [vmem:[#allocation8 + $0x50] sm:$0xff]  ;;  %v429_v55 = vld [vmem:[#allocation8 + $0x78] sm:$0xff]  ;;  %v1304_v58 = vpack.c.bf16 %v287_v53, %v285_v52  ;;  %v434_v19 = vld [vmem:[#allocation8 + $0xa0] sm:$0xff] }
  0x7e   :  { %1243 = vmatpush1.bf16.msra.mxu0 %v1242_v0  ;;  %v156_v0 = vld [vmem:[#allocation7 + $0x1f8] sm:$0xff]  ;;  %1289 = vmatprep.subr.bf16.mxu1 %v1288_v5  ;;  %v1346_v56 = vpack.c.bf16 %v424_v51, %v422_v44  ;;  %v286_v60 = vld [vmem:[#allocation10 + $0x110] sm:$0xff]  ;;  %v430_v5 = vld [vmem:[#allocation8 + $0x80] sm:$0xff] }
  0x7f   :  { %1245 = vmatprep.subr.bf16.mxu0 %v1244_v1  ;;  %v153_v1 = vld [vmem:[#allocation7 + $0x1e0] sm:$0xff]  ;;  %v1268_v8 = vpack.c.bf16 %v156_v0, %v154_v63  ;;  %v428_v62 = vld [vmem:[#allocation8 + $0x70] sm:$0xff]  ;;  %v289_v63 = vld [vmem:[#allocation10 + $0x128] sm:$0xff] }
  0x80   :  { %v1270_v15 = vpack.c.bf16 %v155_v4, %v153_v1  ;;  %v291_v0 = vld [vmem:[#allocation10 + $0x138] sm:$0xff]  ;;  %v431_v1 = vld [vmem:[#allocation8 + $0x88] sm:$0xff]  ;;  %v1350_v4 = vpack.c.bf16 %v428_v62, %v426_v57  ;;  %v432_v11 = vld [vmem:[#allocation8 + $0x90] sm:$0xff] }
  0x81   :  { %v433_v2 = vld [vmem:[#allocation8 + $0x98] sm:$0xff]  ;;  %v1354_v18 = vpack.c.bf16 %v432_v11, %v430_v5  ;;  %v436_v24 = vld [vmem:[#allocation8 + $0xb0] sm:$0xff]  ;;  %v297_v25 = vld [vmem:[#allocation10 + $0x168] sm:$0xff] }
  0x82   :  { %1247 = vmatpush1.bf16.msra.mxu0 %v1246_v6  ;;  %v268_v6 = vld [vmem:[#allocation10 + $0x80] sm:$0xff]  ;;  %v1352_v10 = vpack.c.bf16 %v433_v2, %v431_v1  ;;  %v299_v26 = vld [vmem:[#allocation10 + $0x178] sm:$0xff]  ;;  %v1358_v31 = vpack.c.bf16 %v436_v24, %v434_v19  ;;  %v302_v51 = vld [vmem:[#allocation10 + $0x190] sm:$0xff] }
  0x83   :  { %1249 = vmatprep.subr.bf16.mxu0 %v1248_v7  ;;  %v270_v7 = vld [vmem:[#allocation10 + $0x90] sm:$0xff]  ;;  %v438_v32 = vld [vmem:[#allocation8 + $0xc0] sm:$0xff]  ;;  %v309_v1 = vld [vmem:[#allocation10 + $0x1c8] sm:$0xff] }
  0x84   :  { %v1290_v14 = vpack.c.bf16 %v270_v7, %v268_v6  ;;  %v1308_v6 = vpack.c.bf16 %v291_v0, %v289_v63  ;;  %v288_v7 = vld [vmem:[#allocation10 + $0x120] sm:$0xff]  ;;  %v444_v53 = vld [vmem:[#allocation8 + $0xf0] sm:$0xff]  ;;  %v311_v2 = vld [vmem:[#allocation10 + $0x1d8] sm:$0xff] }
  0x85   :  { %v296_v34 = vld [vmem:[#allocation10 + $0x160] sm:$0xff]  ;;  %v306_v62 = vld [vmem:[#allocation10 + $0x1b0] sm:$0xff] }
  0x86   :  { %1251 = vmatpush1.bf16.msra.mxu0 %v1250_v12  ;;  %v415_v12 = vld [vmem:[#allocation8 + $0x8] sm:$0xff]  ;;  %1291 = vmatpush1.bf16.msra.mxu1 %v1290_v14  ;;  %v448_v0 = vld [vmem:[#allocation8 + $0x110] sm:$0xff] }
  0x87   :  { %1253 = vmatprep.subr.bf16.mxu0 %v1252_v13  ;;  %v417_v13 = vld [vmem:[#allocation8 + $0x18] sm:$0xff]  ;;  %1293 = vmatprep.subr.bf16.mxu1 %v1292_v17  ;;  %v435_v14 = vld [vmem:[#allocation8 + $0xa8] sm:$0xff] }
  0x88   :  { %v1336_v20 = vpack.c.bf16 %v417_v13, %v415_v12  ;;  %v293_v12 = vld [vmem:[#allocation10 + $0x148] sm:$0xff]  ;;  %v295_v13 = vld [vmem:[#allocation10 + $0x158] sm:$0xff] }
  0x8a   :  { %1255 = vmatpush1.bf16.msra.mxu0 %v1254_v22  ;;  %v416_v22 = vld [vmem:[#allocation8 + $0x10] sm:$0xff]  ;;  %1295 = vmatpush1.bf16.msra.mxu1 %v1294_v27  ;;  %v439_v27 = vld [vmem:[#allocation8 + $0xc8] sm:$0xff] }
  0x8b   :  { %1257 = vmatprep.subr.bf16.mxu0 %v1256_v28  ;;  %v1338_v28 = vpack.c.bf16 %v416_v22, %v414_v21  ;;  %1297 = vmatprep.subr.bf16.mxu1 %v1296_v36  ;;  %v292_v21 = vld [vmem:[#allocation10 + $0x140] sm:$0xff]  ;;  %v294_v22 = vld [vmem:[#allocation10 + $0x150] sm:$0xff] }
  0x8c   :  { %v1314_v29 = vpack.c.bf16 %v294_v22, %v292_v21  ;;  %v298_v36 = vld [vmem:[#allocation10 + $0x170] sm:$0xff]  ;;  %v459_v22 = vld [vmem:[#allocation8 + $0x168] sm:$0xff] }
  0x8d   :  { %v1318_v44 = vpack.c.bf16 %v298_v36, %v296_v34  ;;  %v456_v21 = vld [vmem:[#allocation8 + $0x150] sm:$0xff]  ;;  %v467_v36 = vld [vmem:[#allocation8 + $0x1a8] sm:$0xff] }
  0x8e   :  { %1259 = vmatpush1.bf16.msra.mxu0 %v1258_v39  ;;  %v423_v39 = vld [vmem:[#allocation8 + $0x48] sm:$0xff]  ;;  %1299 = vmatpush1.bf16.msra.mxu1 %v1298_v41  ;;  %v464_v34 = vld [vmem:[#allocation8 + $0x190] sm:$0xff] }
  0x8f   :  { %1261 = vmatprep.subr.bf16.mxu0 %v1260_v45  ;;  %v1300_v45 = vpack.c.bf16 %v283_v38, %v281_v37  ;;  %v1344_v49 = vpack.c.bf16 %v425_v40, %v423_v39  ;;  %v440_v38 = vld [vmem:[#allocation8 + $0xd0] sm:$0xff]  ;;  %v301_v39 = vld [vmem:[#allocation10 + $0x188] sm:$0xff]  ;;  %v303_v40 = vld [vmem:[#allocation10 + $0x198] sm:$0xff] }
  0x90   :  { %v443_v41 = vld [vmem:[#allocation8 + $0xe8] sm:$0xff] }
  0x91   :  { %1301 = vmatprep.subr.bf16.mxu1 %v1300_v45  ;;  %v1362_v45 = vpack.c.bf16 %v440_v38, %v438_v32 }
  0x92   :  { %1263 = vmatpush1.bf16.msra.mxu0 %v1262_v54  ;;  %v427_v54 = vld [vmem:[#allocation8 + $0x68] sm:$0xff] }
  0x93   :  { %1265 = vmatprep.subr.bf16.mxu0 %v1264_v59  ;;  %v284_v59 = vld [vmem:[#allocation10 + $0x100] sm:$0xff]  ;;  %v1348_v61 = vpack.c.bf16 %v429_v55, %v427_v54  ;;  %v305_v54 = vld [vmem:[#allocation10 + $0x1a8] sm:$0xff]  ;;  %v307_v55 = vld [vmem:[#allocation10 + $0x1b8] sm:$0xff] }
  0x96   :  { %1267 = vmatpush1.bf16.msra.mxu0 %v1266_v3  ;;  %v1306_v3 = vpack.c.bf16 %v286_v60, %v284_v59  ;;  %v446_v59 = vld [vmem:[#allocation8 + $0x100] sm:$0xff]  ;;  %v1324_v60 = vpack.c.bf16 %v307_v55, %v305_v54 }
  0x97   :  { %1269 = vmatprep.subr.bf16.mxu0 %v1268_v8  ;;  %v290_v8 = vld [vmem:[#allocation10 + $0x130] sm:$0xff]  ;;  %v474_v55 = vld [vmem:[#allocation8 + $0x1e0] sm:$0xff] }
  0x98   :  { %v1310_v17 = vpack.c.bf16 %v290_v8, %v288_v7  ;;  %v1328_v7 = vpack.c.bf16 %v311_v2, %v309_v1  ;;  %v308_v8 = vld [vmem:[#allocation10 + $0x1c0] sm:$0xff] }
  0x9a   :  { %1271 = vmatpush1.bf16.msra.mxu0 %v1270_v15  ;;  %v437_v15 = vld [vmem:[#allocation8 + $0xb8] sm:$0xff] }
  0x9b   :  { %1337 = vmatprep.subr.bf16.mxu0 %v1336_v20  ;;  %v1312_v20 = vpack.c.bf16 %v295_v13, %v293_v12  ;;  %v1356_v23 = vpack.c.bf16 %v437_v15, %v435_v14  ;;  %v450_v12 = vld [vmem:[#allocation8 + $0x120] sm:$0xff]  ;;  %v452_v13 = vld [vmem:[#allocation8 + $0x130] sm:$0xff]  ;;  %v455_v14 = vld [vmem:[#allocation8 + $0x148] sm:$0xff] }
  0x9c   :  { %v457_v15 = vld [vmem:[#allocation8 + $0x158] sm:$0xff] }
  0x9d   :  { %233 = vmatmul.mubr.f32.vlgmr.msra.gmra.mrb[0].mxu0 %v1754_v50  ;;  %v1302_v50 = vpack.c.bf16 %v282_v48, %v280_v46  ;;  %v442_v46 = vld [vmem:[#allocation8 + $0xe0] sm:$0xff]  ;;  %v1320_v48 = vpack.c.bf16 %v303_v40, %v301_v39  ;;  %v1376_v19 = vpack.c.bf16 %v457_v15, %v455_v14 }
  0x9e   :  { %1339 = vmatpush1.bf16.msra.mxu0 %v1338_v28  ;;  %542 = vmatprep.mubr.f32.mxu0 %v1766_v30  ;;  %v441_v28 = vld [vmem:[#allocation8 + $0xd8] sm:$0xff]  ;;  %v466_v40 = vld [vmem:[#allocation8 + $0x1a0] sm:$0xff] }
  0x9f   :  { %1341 = vmatprep.subr.bf16.mxu0 %v1340_v33  ;;  %1303 = vmatpush1.bf16.msra.mxu1 %v1302_v50  ;;  %v1316_v33 = vpack.c.bf16 %v299_v26, %v297_v25  ;;  %v1360_v37 = vpack.c.bf16 %v441_v28, %v439_v27  ;;  %v447_v50 = vld [vmem:[#allocation8 + $0x108] sm:$0xff]  ;;  %v458_v26 = vld [vmem:[#allocation8 + $0x160] sm:$0xff]  ;;  %v460_v27 = vld [vmem:[#allocation8 + $0x170] sm:$0xff] }
  0xa0   :  { %1305 = vmatprep.subr.bf16.mxu1 %v1304_v58  ;;  %v1366_v58 = vpack.c.bf16 %v444_v53, %v442_v46  ;;  %v463_v28 = vld [vmem:[#allocation8 + $0x188] sm:$0xff] }
  0xa2   :  { %1343 = vmatpush1.bf16.msra.mxu0 %v1342_v43  ;;  %v445_v43 = vld [vmem:[#allocation8 + $0xf8] sm:$0xff] }
  0xa3   :  { %1345 = vmatprep.subr.bf16.mxu0 %v1344_v49  ;;  %1307 = vmatpush1.bf16.msra.mxu1 %v1306_v3  ;;  %v300_v49 = vld [vmem:[#allocation10 + $0x180] sm:$0xff]  ;;  %v1364_v52 = vpack.c.bf16 %v445_v43, %v443_v41  ;;  %v451_v3 = vld [vmem:[#allocation8 + $0x128] sm:$0xff]  ;;  %v468_v41 = vld [vmem:[#allocation8 + $0x1b0] sm:$0xff] }
  0xa4   :  { %1309 = vmatprep.subr.bf16.mxu1 %v1308_v6  ;;  %v1322_v57 = vpack.c.bf16 %v302_v51, %v300_v49  ;;  %v1370_v6 = vpack.c.bf16 %v448_v0, %v446_v59  ;;  %v471_v43 = vld [vmem:[#allocation8 + $0x1c8] sm:$0xff]  ;;  %v472_v49 = vld [vmem:[#allocation8 + $0x1d0] sm:$0xff] }
  0xa5   :  { %v475_v51 = vld [vmem:[#allocation8 + $0x1e8] sm:$0xff] }
  0xa6   :  { %1347 = vmatpush1.bf16.msra.mxu0 %v1346_v56  ;;  %v449_v56 = vld [vmem:[#allocation8 + $0x118] sm:$0xff] }
  0xa7   :  { %1349 = vmatprep.subr.bf16.mxu0 %v1348_v61  ;;  %1311 = vmatpush1.bf16.msra.mxu1 %v1310_v17  ;;  %v304_v61 = vld [vmem:[#allocation10 + $0x1a0] sm:$0xff]  ;;  %v1368_v63 = vpack.c.bf16 %v449_v56, %v447_v50  ;;  %v476_v50 = vld [vmem:[#allocation8 + $0x1f0] sm:$0xff] }
  0xa8   :  { %1313 = vmatprep.subr.bf16.mxu1 %v1312_v20  ;;  %v1326_v5 = vpack.c.bf16 %v306_v62, %v304_v61  ;;  %v454_v20 = vld [vmem:[#allocation8 + $0x140] sm:$0xff]  ;;  %v1398_v56 = vpack.c.bf16 %v476_v50, %v474_v55  ;;  %v314_v61 = vld [vmem:[#allocation10 + $0x1f0] sm:$0xff] }
  0xa9   :  { %v1378_v24 = vpack.c.bf16 %v456_v21, %v454_v20 }
  0xaa   :  { %1351 = vmatpush1.bf16.msra.mxu0 %v1350_v4  ;;  %v453_v4 = vld [vmem:[#allocation8 + $0x138] sm:$0xff] }
  0xab   :  { %1353 = vmatprep.subr.bf16.mxu0 %v1352_v10  ;;  %1315 = vmatpush1.bf16.msra.mxu1 %v1314_v29  ;;  %v310_v10 = vld [vmem:[#allocation10 + $0x1d0] sm:$0xff]  ;;  %v1372_v11 = vpack.c.bf16 %v453_v4, %v451_v3  ;;  %v465_v29 = vld [vmem:[#allocation8 + $0x198] sm:$0xff] }
  0xac   :  { %1317 = vmatprep.subr.bf16.mxu1 %v1316_v33  ;;  %v1330_v17 = vpack.c.bf16 %v310_v10, %v308_v8  ;;  %v1384_v32 = vpack.c.bf16 %v465_v29, %v463_v28  ;;  %v462_v33 = vld [vmem:[#allocation8 + $0x180] sm:$0xff]  ;;  %v387_v29 = vsub.f32 %v1758_v9, %v1750_v47 }
  0xad   :  { %v1386_v38 = vpack.c.bf16 %v464_v34, %v462_v33 }
  0xae   :  { %1355 = vmatpush1.bf16.msra.mxu0 %v1354_v18  ;;  %v1374_v18 = vpack.c.bf16 %v452_v13, %v450_v12 }
  0xaf   :  { %1357 = vmatprep.subr.bf16.mxu0 %v1356_v23  ;;  %1319 = vmatpush1.bf16.msra.mxu1 %v1318_v44  ;;  %v461_v23 = vld [vmem:[#allocation8 + $0x178] sm:$0xff] }
  0xb0   :  { %1321 = vmatprep.subr.bf16.mxu1 %v1320_v48  ;;  %v1380_v25 = vpack.c.bf16 %v461_v23, %v459_v22  ;;  %v473_v44 = vld [vmem:[#allocation8 + $0x1d8] sm:$0xff]  ;;  %v470_v48 = vld [vmem:[#allocation8 + $0x1c0] sm:$0xff] }
  0xb1   :  { %v1392_v46 = vpack.c.bf16 %v473_v44, %v471_v43  ;;  %v1394_v53 = vpack.c.bf16 %v472_v49, %v470_v48  ;;  %v1803_v49 = vsub.s32 0, %v1745_v35 }
  0xb2   :  { %1359 = vmatpush1.bf16.msra.mxu0 %v1358_v31  ;;  %v1382_v31 = vpack.c.bf16 %v460_v27, %v458_v26 }
  0xb3   :  { %1361 = vmatprep.subr.bf16.mxu0 %v1360_v37  ;;  %1323 = vmatpush1.bf16.msra.mxu1 %v1322_v57  ;;  %v469_v37 = vld [vmem:[#allocation8 + $0x1b8] sm:$0xff]  ;;  %v313_v57 = vld [vmem:[#allocation10 + $0x1e8] sm:$0xff] }
  0xb4   :  { %1325 = vmatprep.subr.bf16.mxu1 %v1324_v60  ;;  %v1388_v39 = vpack.c.bf16 %v469_v37, %v467_v36  ;;  %v312_v60 = vld [vmem:[#allocation10 + $0x1e0] sm:$0xff] }
  0xb5   :  { %v1334_v62 = vpack.c.bf16 %v314_v61, %v312_v60 }
  0xb6   :  { %1363 = vmatpush1.bf16.msra.mxu0 %v1362_v45  ;;  %v1390_v45 = vpack.c.bf16 %v468_v41, %v466_v40 }
  0xb7   :  { %1365 = vmatprep.subr.bf16.mxu0 %v1364_v52  ;;  %1327 = vmatpush1.bf16.msra.mxu1 %v1326_v5  ;;  %v477_v52 = vld [vmem:[#allocation8 + $0x1f8] sm:$0xff] }
  0xb8   :  { %1329 = vmatprep.subr.bf16.mxu1 %v1328_v7  ;;  %v1396_v54 = vpack.c.bf16 %v477_v52, %v475_v51 }
  0xba   :  { %1367 = vmatpush1.bf16.msra.mxu0 %v1366_v58  ;;  %v315_v58 = vld [vmem:[#allocation10 + $0x1f8] sm:$0xff] }
  0xbb   :  { %1369 = vmatprep.subr.bf16.mxu0 %v1368_v63  ;;  %1331 = vmatpush1.bf16.msra.mxu1 %v1330_v17  ;;  %v1332_v59 = vpack.c.bf16 %v315_v58, %v313_v57 }
  0xbd   :  { %1333 = vmatprep.subr.bf16.mxu1 %v1332_v59 }
  0xbe   :  { %1371 = vmatpush1.bf16.msra.mxu0 %v1370_v6  ;;  %v1623_v6 = vmov 1934713408  }
  0xbf   :  { %1373 = vmatprep.subr.bf16.mxu0 %v1372_v11  ;;  %1335 = vmatpush1.bf16.msra.mxu1 %v1334_v62  ;;  %v603_v7 = vunpack.c.l.s4 %v1623_v6 }
  0xc1   :  { %v604_v12 = vunpack.c.0.s8 %v603_v7 }
  0xc2   :  { %1375 = vmatpush1.bf16.msra.mxu0 %v1374_v18 }
  0xc3   :  { %1377 = vmatprep.subr.bf16.mxu0 %v1376_v19  ;;  %v1782_v18 = vsub.s32 %v604_v12, %v1745_v35 }
  0xc6   :  { %1379 = vmatpush1.bf16.msra.mxu0 %v1378_v24 }
  0xc7   :  { %1381 = vmatprep.subr.bf16.mxu0 %v1380_v25 }
  0xca   :  { %1383 = vmatpush1.bf16.msra.mxu0 %v1382_v31  ;;  %v395_v31 = vrot.slane %v387_v29, %v1748_v42 }
  0xcb   :  { %1385 = vmatprep.subr.bf16.mxu0 %v1384_v32  ;;  %v1624_v32 = vmov 1966171168  }
  0xcc   :  { %v621_v33 = vunpack.c.l.s4 %v1624_v32  ;;  %v396_v34 = vcombine.high %v395_v31, %v395_v31 }
  0xce   :  { %1387 = vmatpush1.bf16.msra.mxu0 %v1386_v38 }
  0xcf   :  { %1389 = vmatprep.subr.bf16.mxu0 %v1388_v39  ;;  %v622_v39 = vunpack.c.0.s8 %v621_v33 }
  0xd1   :  { %v1796_v43 = vsub.s32 %v622_v39, %v1745_v35 }
  0xd2   :  { %1391 = vmatpush1.bf16.msra.mxu0 %v1390_v45 }
  0xd3   :  { %1393 = vmatprep.subr.bf16.mxu0 %v1392_v46 }
  0xd6   :  { %1395 = vmatpush1.bf16.msra.mxu0 %v1394_v53 }
  0xd7   :  { %1397 = vmatprep.subr.bf16.mxu0 %v1396_v54 }
  0xda   :  { %1399 = vmatpush1.bf16.msra.mxu0 %v1398_v56 }
  0xdd   :  { %543 = vmatmul.mubr.f32.vlgmr.msra.gmra.mrb[2].mxu0 %v1762_v16 }
 0x170   :  { %v234_v63 = vpop.f32.mrb[0].mxu0 }
 0x171   :  { %v236_v0 = vpop.f32.mrb[1].mxu0  ;;  %v250_v2 = vmul.f32 %v1762_v16, %v234_v63 }
 0x172   :  { %v251_v1 = vmul.f32 %v1766_v30, %v236_v0 }
 0x174   :  { %380 = vmatprep.mubr.f32.mxu1 %v251_v1 }
 0x175   :  { %381 = vmatmul.mubr.f32.vlgmr.msra.gmra.mrb[0].mxu1 %v250_v2 }
 0x1b0   :  { %v544_v3 = vpop.f32.mrb[2].mxu0 }
 0x1b1   :  { %556 = vrot.lane.b32.xlu1 %v544_v3, %s1620_s5  ;;  %550 = vrot.lane.b32.xlu0 %v544_v3, %s1621_s24  ;;  %v546_v4 = vpop.f32.mrb[3].mxu0 }
 0x1b5   :  { %553 = vrot.lane.b32.xlu0 %v544_v3, %s1622_s25  ;;  %560 = vrot.lane.b32.xlu1 %v546_v4, %s1621_s24 }
 0x1b9   :  { %563 = vrot.lane.b32.xlu0 %v546_v4, %s1622_s25  ;;  %566 = vrot.lane.b32.xlu1 %v546_v4, %s1620_s5 }
 0x223   :  { %v557_v16 = vpop.permute.xlu1 %556  ;;  %v551_v30 = vpop.permute.xlu0 %550 }
 0x224   :  { %v577_v5 = vcombine.low %v551_v30, %v557_v16 }
 0x226   :  { %v584_v11 = vrot.slane %v577_v5, %v1748_v42 }
 0x227   :  { %v554_v8 = vpop.permute.xlu0 %553  ;;  %v561_v10 = vpop.permute.xlu1 %560 }
 0x228   :  { %v569_v13 = vcombine.low %v544_v3, %v554_v8 }
 0x22a   :  { %v576_v14 = vrot.slane %v569_v13, %v1748_v42 }
 0x22b   :  { %v564_v15 = vpop.permute.xlu0 %563  ;;  %v567_v17 = vpop.permute.xlu1 %566 }
 0x22c   :  { %v601_v19 = vcombine.low %v576_v14, %v584_v11  ;;  %v585_v20 = vcombine.low %v546_v4, %v564_v15  ;;  %v593_v21 = vcombine.low %v561_v10, %v567_v17 }
 0x22e   :  { %v592_v22 = vrot.slane %v585_v20, %v1748_v42  ;;  %v600_v23 = vrot.slane %v593_v21, %v1748_v42  ;;  %v608_v24 = vrot.slane %v601_v19, %v1782_v18 }
 0x230   :  { %v609_v25 = vcombine.low %v592_v22, %v600_v23 }
 0x232   :  { %v616_v26 = vrot.slane %v609_v25, %v1782_v18 }
 0x234   :  { %v1788_v27 = vcombine.low %v608_v24, %v616_v26  ;;  %v1790_v28 = vcombine.high %v608_v24, %v616_v26 }
 0x248   :  { %v382_v36 = vpop.f32.mrb[0].mxu1 }
 0x249   :  { %v399_v37 = vmul.f32 %v395_v31, %v382_v36  ;;  %v384_v38 = vpop.f32.mrb[1].mxu1 }
 0x24a   :  { %v400_v40 = vmul.f32 %v396_v34, %v384_v38 }
 0x24c   :  { %v403_v41 = vcombine.low %v399_v37, %v400_v40 }
 0x24e   :  { %v410_v44 = vrot.slane %v403_v41, %v1748_v42 }
 0x250   :  { %v412_v45 = vadd.f32 %v410_v44, %v1750_v47 }
 0x252   :  { %v626_v46 = vrot.slane %v412_v45, %v1796_v43  ;;  %413 = vst [vmem:[#allocation11] sm:$0xf] %v412_v45 }
 0x254   :  { %709 = vrot.lane.b32.xlu0 %v626_v46, %s1621_s24  ;;  %v627_v48 = vcombine.high %v626_v46, %v626_v46  ;;  %v631_v51 = vrot.slane %v626_v46, %v1803_v49  ;;  %v689_v54 = vrot.slane %v626_v46, 1 }
 0x256   :  { %711 = vrot.lane.b32.xlu1 %v627_v48, %s1621_s24  ;;  %v635_v47 = vrot.slane %v627_v48, %v1803_v49  ;;  %v690_v35 = vrot.slane %v627_v48, 1  ;;  %v638_v52 = vmul.f32 %v631_v51, %v1788_v27  ;;  %v694_v57 = vrot.slane %v689_v54, %v1803_v49 }
 0x257   :  { %v1625_v54 = vmov 0  }
 0x258   :  { %733 = vrot.lane.b32.xlu0 %v626_v46, %s1622_s25  ;;  %v698_v53 = vrot.slane %v690_v35, %v1803_v49  ;;  %v641_v55 = vsel %vm640_vm0, %v638_v52, 0.0  ;;  %v639_v56 = vmul.f32 %v635_v47, %v1790_v28  ;;  %v701_v60 = vmul.f32 %v694_v57, %v1788_v27  ;;  %1424 = vset.pattern.permute.xlu1 %v1625_v54 }
 0x259   :  { %1428 = vset.pattern.permute.xlu0 %v1625_v54 }
 0x25a   :  { %735 = vrot.lane.b32.xlu1 %v627_v48, %s1622_s25  ;;  %v702_v50 = vmul.f32 %v698_v53, %v1790_v28  ;;  %v644_v59 = vsel %vm640_vm0, %v639_v56, 0.0  ;;  %v703_v61 = vsel %vm640_vm0, %v701_v60, 0.0 }
 0x25c   :  { %647 = vrot.lane.b32.xlu0 %v631_v51, %s1621_s24  ;;  %v706_v58 = vsel %vm640_vm0, %v702_v50, 0.0 }
 0x25e   :  { %649 = vrot.lane.b32.xlu1 %v635_v47, %s1621_s24 }
 0x260   :  { %661 = vrot.lane.b32.xlu0 %v631_v51, %s1622_s25 }
 0x262   :  { %663 = vrot.lane.b32.xlu1 %v635_v47, %s1622_s25 }
 0x264   :  { %675 = vrot.lane.b32.xlu0 %v631_v51, %s1620_s5 }
 0x266   :  { %677 = vrot.lane.b32.xlu1 %v635_v47, %s1620_s5 }
 0x268   :  { %757 = vrot.lane.b32.xlu0 %v626_v46, %s1620_s5 }
 0x26a   :  { %759 = vrot.lane.b32.xlu1 %v627_v48, %s1620_s5 }
 0x287   :  { %642 = vadd.xlane.f32.xlu0 %v641_v55 }
 0x28b   :  { %707 = vadd.xlane.f32.xlu0 %v706_v58 }
 0x28e   :  { %645 = vadd.xlane.f32.xlu1 %v644_v59 }
 0x292   :  { %704 = vadd.xlane.f32.xlu1 %v703_v61 }
 0x2c6   :  { %v710_v62 = vpop.permute.xlu0 %709 }
 0x2c7   :  { %v713_v4 = vrot.slane %v710_v62, 1 }
 0x2c8   :  { %v712_v63 = vpop.permute.xlu1 %711 }
 0x2c9   :  { %v718_v8 = vrot.slane %v713_v4, %v1803_v49  ;;  %v714_v10 = vrot.slane %v712_v63, 1 }
 0x2ca   :  { %v734_v0 = vpop.permute.xlu0 %733 }
 0x2cb   :  { %v737_v12 = vrot.slane %v734_v0, 1  ;;  %v722_v20 = vrot.slane %v714_v10, %v1803_v49  ;;  %v725_v23 = vmul.f32 %v718_v8, %v1788_v27 }
 0x2cc   :  { %v736_v1 = vpop.permute.xlu1 %735 }
 0x2cd   :  { %v738_v21 = vrot.slane %v736_v1, 1  ;;  %v742_v24 = vrot.slane %v737_v12, %v1803_v49  ;;  %v727_v36 = vsel %vm640_vm0, %v725_v23, 0.0  ;;  %v726_v37 = vmul.f32 %v722_v20, %v1790_v28 }
 0x2ce   :  { %v648_v2 = vpop.permute.xlu0 %647 }
 0x2cf   :  { %v653_v3 = vmul.f32 %v648_v2, %v1788_v27  ;;  %v746_v33 = vrot.slane %v738_v21, %v1803_v49  ;;  %v749_v41 = vmul.f32 %v742_v24, %v1788_v27  ;;  %v730_v44 = vsel %vm640_vm0, %v726_v37, 0.0 }
 0x2d0   :  { %v650_v16 = vpop.permute.xlu1 %649 }
 0x2d1   :  { %v654_v30 = vmul.f32 %v650_v16, %v1790_v28  ;;  %v655_v5 = vsel %vm640_vm0, %v653_v3, 0.0  ;;  %v751_v46 = vsel %vm640_vm0, %v749_v41, 0.0  ;;  %v750_v48 = vmul.f32 %v746_v33, %v1790_v28 }
 0x2d2   :  { %v662_v6 = vpop.permute.xlu0 %661  ;;  %656 = vadd.xlane.f32.xlu0 %v655_v5 }
 0x2d3   :  { %v667_v7 = vmul.f32 %v662_v6, %v1788_v27  ;;  %v658_v14 = vsel %vm640_vm0, %v654_v30, 0.0  ;;  %v754_v47 = vsel %vm640_vm0, %v750_v48, 0.0  ;;  %v1626_v48 = vmov 1  }
 0x2d4   :  { %v664_v11 = vpop.permute.xlu1 %663 }
 0x2d5   :  { %v668_v13 = vmul.f32 %v664_v11, %v1790_v28  ;;  %v669_v15 = vsel %vm640_vm0, %v667_v7, 0.0 }
 0x2d6   :  { %v676_v17 = vpop.permute.xlu0 %675  ;;  %659 = vadd.xlane.f32.xlu0 %v658_v14  ;;  %670 = vadd.xlane.f32.xlu1 %v669_v15 }
 0x2d7   :  { %v681_v19 = vmul.f32 %v676_v17, %v1788_v27  ;;  %v672_v26 = vsel %vm640_vm0, %v668_v13, 0.0 }
 0x2d8   :  { %v678_v22 = vpop.permute.xlu1 %677 }
 0x2d9   :  { %v682_v25 = vmul.f32 %v678_v22, %v1790_v28  ;;  %v683_v29 = vsel %vm640_vm0, %v681_v19, 0.0 }
 0x2da   :  { %v758_v31 = vpop.permute.xlu0 %757  ;;  %673 = vadd.xlane.f32.xlu0 %v672_v26  ;;  %684 = vadd.xlane.f32.xlu1 %v683_v29 }
 0x2db   :  { %v761_v32 = vrot.slane %v758_v31, 1  ;;  %v686_v40 = vsel %vm640_vm0, %v682_v25, 0.0 }
 0x2dc   :  { %v760_v34 = vpop.permute.xlu1 %759 }
 0x2dd   :  { %v766_v38 = vrot.slane %v761_v32, %v1803_v49  ;;  %v762_v39 = vrot.slane %v760_v34, 1 }
 0x2de   :  { %687 = vadd.xlane.f32.xlu0 %v686_v40  ;;  %728 = vadd.xlane.f32.xlu1 %v727_v36 }
 0x2df   :  { %v770_v45 = vrot.slane %v762_v39, %v1803_v49  ;;  %v773_v51 = vmul.f32 %v766_v38, %v1788_v27  ;;  %v802_v27 = vld [vmem:[%s1977_s2] sm:$0x3]  ;;  %s1634_s2 = smov [#allocation11]  }
 0x2e0   :  { %vm803_vm1 = vcmp.ne.s32.totalorder %v802_v27, 0  ;;  %s1182_s15 = sshll.u32 %s1634_s2, 4  ;;  %s1183_s15 = int_to_ptr.vmem [resolvable:$true] %s1182_s15 }
 0x2e1   :  { %v775_v35 = vsel %vm640_vm0, %v773_v51, 0.0  ;;  %v774_v52 = vmul.f32 %v770_v45, %v1790_v28  ;;  %v804_v57 = vsel %vm803_vm1, 1, %v1625_v54  ;;  %v1887_v51 = vrot.slane %v1758_v9, %v1796_v43  ;;  %s1558_s17 = scalar_lea.vmem %s1183_s15, 64  ;;  %p1563_p13 = scmp.lt.s32.totalorder %s1183_s15, %s1183_s15 }
 0x2e2   :  { %731 = vadd.xlane.f32.xlu0 %v730_v44  ;;  %752 = vadd.xlane.f32.xlu1 %v751_v46  ;;  %v811_v28 = vrot.slane %v804_v57, %v1796_v43  ;;  %v1630_v9 = vmov 6   ;;  %p1559_p12 = scmp.ne.s32.totalorder %s1183_s15, %s1558_s17  ;;  %p1564_p0 = scmp.lt.s32.totalorder %s1558_s17, %s1558_s17 }
 0x2e3   :  { %v778_v53 = vsel %vm640_vm0, %v774_v52, 0.0  ;;  %v1893_v52 = vcombine.high %v1887_v51, %v1887_v51 }
 0x2e4   :  { %v819_v62 = vrot.slane %v811_v28, %v1796_v43  ;;  %v812_v63 = vcombine.high %v811_v28, %v811_v28  ;;  %p1565_p1 = por %p1564_p0, %p1563_p13 }
 0x2e6   :  { %755 = vadd.xlane.f32.xlu0 %v754_v47  ;;  %776 = vadd.xlane.f32.xlu1 %v775_v35  ;;  %vm827_vm2 = vcmp.ne.s32.totalorder %v819_v62, 0  ;;  %v826_v2 = vrot.slane %v812_v63, %v1796_v43  ;;  %v1627_v47 = vmov 4   ;;  %v1628_v35 = vmov 2   ;;  %p1566_p2 = pnand %p1565_p1, %p1559_p12 }
 0x2e7   :  { %v829_v16 = vsel %vm827_vm2, 1, %v1625_v54  ;;  %v1631_v43 = vmov 5  }
 0x2e8   :  { %vm828_vm6 = vcmp.ne.s32.totalorder %v826_v2, 0  ;;  %v834_v7 = vrot.slane %v829_v16, %v1803_v49 }
 0x2e9   :  { %v830_v11 = vsel %vm828_vm6, 1, %v1625_v54  ;;  %v1632_v54 = vmov 7  }
 0x2ea   :  { %779 = vadd.xlane.f32.xlu0 %v778_v53  ;;  %vm839_vm11 = vcmp.eq.s32.totalorder %v834_v7, 1  ;;  %v838_v19 = vrot.slane %v830_v11, %v1803_v49  ;;  %v1629_v53 = vmov 3  }
 0x2ec   :  { %vm840_vm13 = vcmp.eq.s32.totalorder %v838_v19, 1 }
 0x314   :  { %v643_v55 = vpop.xlane.xlu0 %642 }
 0x318   :  { %v708_v56 = vpop.xlane.xlu0 %707 }
 0x31b   :  { %v646_v50 = vpop.xlane.xlu1 %645 }
 0x31f   :  { %v705_v58 = vpop.xlane.xlu1 %704 }
 0x35f   :  { %v657_v59 = vpop.xlane.xlu0 %656 }
 0x360   :  { %v782_v30 = vsel %vm781_vm3, %v643_v55, %v657_v59 }
 0x363   :  { %v660_v60 = vpop.xlane.xlu0 %659  ;;  %v671_v61 = vpop.xlane.xlu1 %670 }
 0x364   :  { %v785_v5 = vsel %vm784_vm4, %v782_v30, %v671_v61  ;;  %v783_v12 = vsel %vm781_vm3, %v646_v50, %v660_v60  ;;  %v885_v50 = vrot.slane %v1887_v51, %v1803_v49 }
 0x367   :  { %v674_v0 = vpop.xlane.xlu0 %673  ;;  %v685_v1 = vpop.xlane.xlu1 %684 }
 0x368   :  { %v788_v6 = vsel %vm787_vm5, %v785_v5, %v685_v1  ;;  %v786_v13 = vsel %vm784_vm4, %v783_v12, %v674_v0  ;;  %v889_v0 = vrot.slane %v1893_v52, %v1803_v49 }
 0x369   :  { %v791_v14 = vsel %vm790_vm7, %v788_v6, %v705_v58 }
 0x36b   :  { %v688_v3 = vpop.xlane.xlu0 %687  ;;  %v729_v4 = vpop.xlane.xlu1 %728 }
 0x36c   :  { %v789_v15 = vsel %vm787_vm5, %v786_v13, %v688_v3  ;;  %v794_v17 = vsel %vm793_vm8, %v791_v14, %v729_v4 }
 0x36d   :  { %v792_v24 = vsel %vm790_vm7, %v789_v15, %v708_v56 }
 0x36f   :  { %v732_v8 = vpop.xlane.xlu0 %731  ;;  %v753_v10 = vpop.xlane.xlu1 %752 }
 0x370   :  { %v797_v20 = vsel %vm796_vm9, %v794_v17, %v753_v10  ;;  %v795_v26 = vsel %vm793_vm8, %v792_v24, %v732_v8  ;;  %v957_v24 = vrot.slane %v1893_v52, 1 }
 0x373   :  { %v756_v21 = vpop.xlane.xlu0 %755  ;;  %v777_v22 = vpop.xlane.xlu1 %776 }
 0x374   :  { %v800_v23 = vsel %vm799_vm10, %v797_v20, %v777_v22  ;;  %v798_v31 = vsel %vm796_vm9, %v795_v26, %v756_v21 }
 0x375   :  { %v841_v25 = vsel %vm839_vm11, %v800_v23, -1e+30 }
 0x376   :  { %v844_v29 = vsel %vm843_vm12, %v841_v25, -inf }
 0x377   :  { %v780_v32 = vpop.xlane.xlu0 %779  ;;  %845 = vmax.xlane.f32.xlu1 %v844_v29 }
 0x378   :  { %v801_v33 = vsel %vm799_vm10, %v798_v31, %v780_v32  ;;  %v973_v31 = vrot.slane %v957_v24, %v1803_v49 }
 0x379   :  { %v842_v34 = vsel %vm840_vm13, %v801_v33, -1e+30 }
 0x37a   :  { %v847_v36 = vsel %vm843_vm12, %v842_v34, -inf }
 0x37b   :  { %848 = vmax.xlane.f32.xlu0 %v847_v36 }
 0x404   :  { %v846_v37 = vpop.xlane.xlu1 %845 }
 0x405   :  { %v850_v38 = vsub.f32 %v841_v25, %v846_v37 }
 0x407   :  { %v852_v39 = vmul.f32 1.442695, %v850_v38 }
 0x408   :  { %v849_v40 = vpop.xlane.xlu0 %848 }
 0x409   :  { %1440 = vpow2.f32 %v852_v39  ;;  %v851_v41 = vsub.f32 %v842_v34, %v849_v40  ;;  %v956_v34 = vrot.slane %v1887_v51, 1 }
 0x40b   :  { %v854_v44 = vmul.f32 1.442695, %v851_v41 }
 0x40d   :  { %1442 = vpow2.f32 %v854_v44 }
 0x413   :  { %v1882_v45 = vpop.eup %1440 }
 0x414   :  { %874 = vperm.xlu1 %1424, %v1882_v45   ;;  %v856_v55 = vsel %vm843_vm12, %v1882_v45, 0.0 }
 0x417   :  { %v1443_v46 = vpop.eup %1442 }
 0x418   :  { %879 = vperm.xlu0 %1428, %v1443_v46   ;;  %1425 = vset.pattern.permute.xlu1 %v1626_v48  ;;  %v859_v27 = vsel %vm843_vm12, %v1443_v46, 0.0 }
 0x419   :  { %897 = vperm.xlu1 %1425, %v1882_v45  }
 0x41c   :  { %1432 = vset.pattern.permute.xlu0 %v1627_v47 }
 0x41d   :  { %959 = vperm.xlu0 %1432, %v1882_v45   ;;  %1426 = vset.pattern.permute.xlu1 %v1628_v35 }
 0x41e   :  { %917 = vperm.xlu1 %1426, %v1882_v45  }
 0x421   :  { %982 = vrot.lane.b32.xlu0 %v1893_v52, %s1621_s24 }
 0x422   :  { %1427 = vset.pattern.permute.xlu1 %v1629_v53  ;;  %1434 = vset.pattern.permute.xlu0 %v1630_v9 }
 0x423   :  { %937 = vperm.xlu1 %1427, %v1882_v45  }
 0x425   :  { %1015 = vperm.xlu0 %1434, %v1882_v45  }
 0x427   :  { %1429 = vset.pattern.permute.xlu1 %v1626_v48 }
 0x429   :  { %1038 = vrot.lane.b32.xlu0 %v1893_v52, %s1620_s5 }
 0x42a   :  { %1436 = vset.pattern.permute.xlu0 %v1631_v43 }
 0x42d   :  { %991 = vperm.xlu0 %1436, %v1443_v46  }
 0x431   :  { %1439 = vset.pattern.permute.xlu0 %v1632_v54 }
 0x447   :  { %857 = vadd.xlane.f32.xlu1 %v856_v55 }
 0x44c   :  { %860 = vadd.xlane.f32.xlu0 %v859_v27 }
 0x458   :  { %901 = vperm.xlu1 %1429, %v1443_v46  }
 0x45c   :  { %1430 = vset.pattern.permute.xlu1 %v1628_v35 }
 0x45d   :  { %921 = vperm.xlu1 %1430, %v1443_v46  }
 0x461   :  { %1431 = vset.pattern.permute.xlu1 %v1629_v53 }
 0x462   :  { %941 = vperm.xlu1 %1431, %v1443_v46  }
 0x466   :  { %980 = vrot.lane.b32.xlu1 %v1887_v51, %s1621_s24 }
 0x467   :  { %1433 = vset.pattern.permute.xlu1 %v1631_v43 }
 0x46a   :  { %987 = vperm.xlu1 %1433, %v1882_v45  }
 0x46e   :  { %1008 = vrot.lane.b32.xlu1 %v1887_v51, %s1622_s25 }
 0x46f   :  { %1435 = vset.pattern.permute.xlu1 %v1627_v47 }
 0x472   :  { %1010 = vrot.lane.b32.xlu1 %v1893_v52, %s1622_s25 }
 0x476   :  { %1036 = vrot.lane.b32.xlu1 %v1887_v51, %s1620_s5 }
 0x47a   :  { %963 = vperm.xlu1 %1435, %v1443_v46  }
 0x47e   :  { %1437 = vset.pattern.permute.xlu1 %v1630_v9 }
 0x47f   :  { %1019 = vperm.xlu1 %1437, %v1443_v46  }
 0x483   :  { %1438 = vset.pattern.permute.xlu1 %v1632_v54 }
 0x493   :  { %v875_v56 = vpop.permute.xlu1 %874 }
 0x494   :  { %v892_v57 = vmul.f32 %v885_v50, %v875_v56 }
 0x497   :  { %v880_v7 = vpop.permute.xlu0 %879 }
 0x498   :  { %v898_v58 = vpop.permute.xlu1 %897  ;;  %v893_v25 = vmul.f32 %v889_v0, %v880_v7 }
 0x499   :  { %v904_v59 = vmul.f32 %v898_v58, %v885_v50 }
 0x49b   :  { %908 = vrot.lane.b32.xlu1 %v904_v59, %s1621_s24 }
 0x49c   :  { %v960_v10 = vpop.permute.xlu0 %959 }
 0x49d   :  { %v918_v28 = vpop.permute.xlu1 %917 }
 0x49e   :  { %v924_v60 = vmul.f32 %v918_v28, %v885_v50 }
 0x4a0   :  { %928 = vrot.lane.b32.xlu0 %v924_v60, %s1622_s25  ;;  %v983_v12 = vpop.permute.xlu0 %982 }
 0x4a1   :  { %v985_v29 = vrot.slane %v983_v12, 1  ;;  %v1633_v12 = vmov 0.0  }
 0x4a2   :  { %v938_v61 = vpop.permute.xlu1 %937 }
 0x4a3   :  { %v944_v62 = vmul.f32 %v938_v61, %v885_v50  ;;  %v1001_v37 = vrot.slane %v985_v29, %v1803_v49 }
 0x4a4   :  { %v1016_v14 = vpop.permute.xlu0 %1015 }
 0x4a5   :  { %948 = vrot.lane.b32.xlu0 %v944_v62, %s1620_s5 }
 0x4a8   :  { %v1039_v17 = vpop.permute.xlu0 %1038 }
 0x4a9   :  { %1047 = vperm.xlu0 %1439, %v1443_v46   ;;  %v1041_v9 = vrot.slane %v1039_v17, 1 }
 0x4ab   :  { %v1057_v58 = vrot.slane %v1041_v9, %v1803_v49 }
 0x4ac   :  { %v992_v21 = vpop.permute.xlu0 %991 }
 0x4ad   :  { %v1005_v47 = vmul.f32 %v1001_v37, %v992_v21 }
 0x4d4   :  { %v858_v63 = vpop.xlane.xlu1 %857 }
 0x4d8   :  { %v902_v1 = vpop.permute.xlu1 %901 }
 0x4d9   :  { %v905_v2 = vmul.f32 %v902_v1, %v889_v0  ;;  %v861_v23 = vpop.xlane.xlu0 %860 }
 0x4da   :  { %1444 = vrcp.f32 %v861_v23 }
 0x4db   :  { %910 = vrot.lane.b32.xlu1 %v905_v2, %s1621_s24  ;;  %1446 = vrcp.f32 %v858_v63 }
 0x4dc   :  { %v922_v3 = vpop.permute.xlu1 %921 }
 0x4dd   :  { %v925_v4 = vmul.f32 %v922_v3, %v889_v0 }
 0x4df   :  { %930 = vrot.lane.b32.xlu1 %v925_v4, %s1622_s25 }
 0x4e1   :  { %v942_v16 = vpop.permute.xlu1 %941 }
 0x4e2   :  { %v945_v30 = vmul.f32 %v942_v16, %v889_v0 }
 0x4e4   :  { %950 = vrot.lane.b32.xlu1 %v945_v30, %s1620_s5  ;;  %v1445_v4 = vpop.eup %1444 }
 0x4e5   :  { %v981_v5 = vpop.permute.xlu1 %980 }
 0x4e6   :  { %v984_v35 = vrot.slane %v981_v5, 1 }
 0x4e8   :  { %1043 = vperm.xlu1 %1438, %v1882_v45   ;;  %v969_v45 = vrot.slane %v956_v34, %v1803_v49  ;;  %v997_v55 = vrot.slane %v984_v35, %v1803_v49 }
 0x4e9   :  { %v988_v6 = vpop.permute.xlu1 %987 }
 0x4ea   :  { %v976_v54 = vmul.f32 %v969_v45, %v960_v10  ;;  %v1004_v28 = vmul.f32 %v997_v55, %v988_v6  ;;  %v1447_v10 = vpop.eup %1446 }
 0x4ed   :  { %v1009_v8 = vpop.permute.xlu1 %1008 }
 0x4ee   :  { %v1012_v27 = vrot.slane %v1009_v8, 1 }
 0x4f0   :  { %v1025_v60 = vrot.slane %v1012_v27, %v1803_v49 }
 0x4f1   :  { %v1011_v11 = vpop.permute.xlu1 %1010 }
 0x4f2   :  { %v1013_v38 = vrot.slane %v1011_v11, 1  ;;  %v1032_v2 = vmul.f32 %v1025_v60, %v1016_v14 }
 0x4f4   :  { %v1029_v52 = vrot.slane %v1013_v38, %v1803_v49 }
 0x4f5   :  { %v1037_v13 = vpop.permute.xlu1 %1036 }
 0x4f6   :  { %v1040_v61 = vrot.slane %v1037_v13, 1 }
 0x4f8   :  { %v1053_v3 = vrot.slane %v1040_v61, %v1803_v49 }
 0x4f9   :  { %v964_v15 = vpop.permute.xlu1 %963 }
 0x4fa   :  { %v977_v40 = vmul.f32 %v973_v31, %v964_v15 }
 0x4fe   :  { %v1020_v19 = vpop.permute.xlu1 %1019 }
 0x4ff   :  { %v1033_v50 = vmul.f32 %v1029_v52, %v1020_v19 }
 0x50d   :  { %v909_v20 = vpop.permute.xlu1 %908 }
 0x50e   :  { %v914_v44 = vadd.f32 %v909_v20, %v892_v57 }
 0x512   :  { %v929_v32 = vpop.permute.xlu0 %928 }
 0x513   :  { %v934_v53 = vadd.f32 %v929_v32, %v914_v44 }
 0x517   :  { %v949_v46 = vpop.permute.xlu0 %948 }
 0x518   :  { %v954_v43 = vadd.f32 %v949_v46, %v934_v53 }
 0x51a   :  { %v978_v57 = vadd.f32 %v976_v54, %v954_v43 }
 0x51c   :  { %v1006_v0 = vadd.f32 %v1004_v28, %v978_v57 }
 0x51e   :  { %v1034_v30 = vadd.f32 %v1032_v2, %v1006_v0 }
 0x528   :  { %v1048_v56 = vpop.permute.xlu0 %1047 }
 0x529   :  { %v1061_v62 = vmul.f32 %v1057_v58, %v1048_v56 }
 0x54d   :  { %v911_v22 = vpop.permute.xlu1 %910 }
 0x54e   :  { %v915_v33 = vadd.f32 %v911_v22, %v893_v25 }
 0x551   :  { %v931_v26 = vpop.permute.xlu1 %930 }
 0x552   :  { %v935_v36 = vadd.f32 %v931_v26, %v915_v33 }
 0x556   :  { %v951_v39 = vpop.permute.xlu1 %950 }
 0x557   :  { %v955_v41 = vadd.f32 %v951_v39, %v935_v36 }
 0x559   :  { %v979_v48 = vadd.f32 %v977_v40, %v955_v41 }
 0x55b   :  { %v1007_v51 = vadd.f32 %v1005_v47, %v979_v48 }
 0x55d   :  { %v1035_v59 = vadd.f32 %v1033_v50, %v1007_v51 }
 0x55f   :  { %v1063_v1 = vadd.f32 %v1061_v62, %v1035_v59 }
 0x561   :  { %v1065_v7 = vmul.f32 %v1445_v4, %v1063_v1 }
 0x563   :  { %v1081_v63 = vcombine.high %v1065_v7, %v1633_v12  ;;  %v1088_v13 = vrot.slane %v1065_v7, %v1748_v42 }
 0x565   :  { %v1095_v49 = vrot.slane %v1081_v63, %v1748_v42 }
 0x567   :  { %v1044_v16 = vpop.permute.xlu1 %1043 }
 0x568   :  { %v1060_v5 = vmul.f32 %v1053_v3, %v1044_v16 }
 0x56a   :  { %v1062_v8 = vadd.f32 %v1060_v5, %v1034_v30 }
 0x56c   :  { %v1064_v11 = vmul.f32 %v1447_v10, %v1062_v8 }
 0x56e   :  { %v1066_v6 = vcombine.high %v1064_v11, %v1633_v12  ;;  %v1073_v15 = vrot.slane %v1064_v11, %v1748_v42 }
 0x570   :  { %v1097_v17 = vcombine.high %v1073_v15, %v1088_v13  ;;  %v1096_v19 = vcombine.low %v1073_v15, %v1088_v13  ;;  %v1080_v14 = vrot.slane %v1066_v6, %v1748_v42 }
 0x572   :  { %v1111_v20 = vrot.slane %v1097_v17, %v1782_v18  ;;  %v1104_v21 = vrot.slane %v1096_v19, %v1782_v18  ;;  %v1112_v22 = vcombine.low %v1080_v14, %v1095_v49  ;;  %v1113_v24 = vcombine.high %v1080_v14, %v1095_v49 }
 0x574   :  { %1137 = vrot.lane.b32.xlu1 %v1111_v20, %s1622_s25  ;;  %v1129_v23 = vcombine.high %v1111_v20, %v1633_v12  ;;  %v1128_v25 = vcombine.high %v1104_v21, %v1633_v12  ;;  %v1120_v26 = vrot.slane %v1112_v22, %v1782_v18 }
 0x576   :  { %1141 = vrot.lane.b32.xlu0 %v1129_v23, %s1621_s24 }
 0x577   :  { %1569 = shalt.err (!%p1566_p2)
}
 0x578   :  { %s1570_s20 = scalar_lea.hbm %s1981_s6, 64 }
 0x579   :  { %p1571_p3 = scmp.ne.s32.totalorder %s1981_s6, %s1570_s20  ;;  %p1574_p4 = scmp.lt.u32.totalorder %s1570_s20, %s1981_s6 }
 0x57b   :  { %p1576_p5 = pnand %p1574_p4, %p1571_p3 }
 0x57d   :  { %1579 = shalt.err (!%p1576_p5)
}
 0x57e   :  { %1185 = dma.vmem_to_hbm [thread:$0]  %s1183_s15, 64, %s1981_s6, [#allocation4]   ;;  %1133 = vrot.lane.b32.xlu1 %v1128_v25, %s1620_s5  ;;  %v1127_v42 = vrot.slane %v1113_v24, %v1782_v18  ;;  %v1130_v29 = vcombine.high %v1120_v26, %v1633_v12  ;;  %vm1157_vm14 = vcmask 523264   ;;  %vm1159_vm15 = vcmask 785408  }
 0x57f   :  { %s1635_s6 = smov [#allocation12]  }
 0x580   :  { %1149 = vrot.lane.b32.xlu0 %v1127_v42, %s1622_s25  ;;  %v1131_v31 = vcombine.high %v1127_v42, %v1633_v12  ;;  %s1192_s16 = sshll.u32 %s1635_s6, 4  ;;  %s1193_s16 = int_to_ptr.vmem [resolvable:$true] %s1192_s16 }
 0x581   :  { %s1580_s27 = scalar_lea.vmem %s1193_s16, 64  ;;  %p1585_p7 = scmp.lt.s32.totalorder %s1193_s16, %s1193_s16 }
 0x582   :  { %1145 = vrot.lane.b32.xlu1 %v1130_v29, %s1620_s5  ;;  %p1581_p6 = scmp.ne.s32.totalorder %s1193_s16, %s1580_s27  ;;  %p1586_p8 = scmp.lt.s32.totalorder %s1580_s27, %s1580_s27 }
 0x584   :  { %p1587_p9 = por %p1586_p8, %p1585_p7 }
 0x586   :  { %1153 = vrot.lane.b32.xlu1 %v1131_v31, %s1621_s24  ;;  %p1588_p10 = pnand %p1587_p9, %p1581_p6 }
 0x5e6   :  { %v1138_v32 = vpop.permute.xlu1 %1137 }
 0x5e8   :  { %v1142_v34 = vpop.permute.xlu0 %1141 }
 0x5f0   :  { %v1134_v33 = vpop.permute.xlu1 %1133 }
 0x5f1   :  { %v1156_v36 = vsel %vm640_vm0, %v1104_v21, %v1134_v33 }
 0x5f2   :  { %v1158_v39 = vsel %vm1157_vm14, %v1156_v36, %v1138_v32  ;;  %v1150_v18 = vpop.permute.xlu0 %1149 }
 0x5f3   :  { %v1160_v44 = vsel %vm1159_vm15, %v1158_v39, %v1142_v34 }
 0x5f4   :  { %v1146_v37 = vpop.permute.xlu1 %1145 }
 0x5f5   :  { %v1161_v38 = vsel %vm640_vm0, %v1120_v26, %v1146_v37 }
 0x5f6   :  { %v1162_v40 = vsel %vm1157_vm14, %v1161_v38, %v1150_v18 }
 0x5f8   :  { %v1154_v41 = vpop.permute.xlu1 %1153 }
 0x5f9   :  { %v1163_v45 = vsel %vm1159_vm15, %v1162_v40, %v1154_v41 }
 0x5fa   :  { %v1166_v46 = vcombine.low %v1160_v44, %v1163_v45 }
 0x5fc   :  { %1207 = vst.sshfl [vmem:[#allocation12] sm:$0x33 pattern:$0x76325410] %v1166_v46 }
 0x5fd   :  { %1591 = shalt.err (!%p1588_p10)
}
 0x5fe   :  { %s1592_s30 = scalar_lea.hbm %s1982_s7, 64 }
 0x5ff   :  { %p1593_p11 = scmp.ne.s32.totalorder %s1982_s7, %s1592_s30  ;;  %p1596_p12 = scmp.lt.u32.totalorder %s1592_s30, %s1982_s7 }
 0x601   :  { %p1598_p13 = pnand %p1596_p12, %p1593_p11 }
 0x603   :  { %1601 = shalt.err (!%p1598_p13)
}
 0x604   :  { %1195 = dma.vmem_to_hbm [thread:$0]  %s1193_s16, 64, %s1982_s7, [#allocation13]  }
 0x605   :  { %1608 = dma.done.wait [#allocation4], 64  }
 0x606   :  { %1609 = vsyncadd [#allocation4], 4294967232 }
 0x607   :  { %1610 = dma.done.wait [#allocation13], 64  }
 0x608   :  { %1611 = vsyncadd [#allocation13], 4294967232 }
 0x609   :  { %1202 = vsyncpa [#allocation3], 1 }
 0x60a   :  { %1203 = vsyncpa [#allocation6], 1 }
 0x60b   :  { %1204 = vsyncpa [#allocation9], 1 }
 0x60c   :  { %1205 = vsyncpa [#allocation4], 1 }
 0x60d   :  { %1206 = vsyncpa [#allocation13], 1 }

</bundles_post_ra>
